<compile_context>
chip_gen: v6e
topology: v6e:2x2x1
jax: 0.10.0
libtpu: 0.0.40
codegen_flags: <defaults>
</compile_context>

<pallas_src>
import jax
import jax.numpy as jnp
import numpy as np
from jax.experimental import pallas as pl
from jax.experimental.pallas import tpu as pltpu

HIDDEN_SIZE = 64
INPUT_SIZE = 12
NUM_LAYERS = 2      # 2-layer recurrence is hard-coded in the kernel body
OUTPUT_SIZE = 1     # kernel's lane-dense (B, T) output slab assumes O == 1


def _sigmoid(x):
    # sigmoid(x) == 0.5 * (tanh(x/2) + 1): one EUP transcendental instead of
    # exp + divide on the serially-dependent recurrence chain.
    return 0.5 * jnp.tanh(0.5 * x) + 0.5


def _lstm_kernel(x_ref,      # (T*B, I)   time-major flattened input
                 wih0_ref,   # (I, 4H)    layer-0 input weight   (i,f,o,g packed)
                 b0_ref,     # (1, 4H)    layer-0 bias b_ih+b_hh (i,f,o,g packed)
                 whh0_ref,   # (H, 4H)    layer-0 recurrent weight
                 wih1_ref,   # (H, 4H)    layer-1 input weight
                 whh1_ref,   # (H, 4H)    layer-1 recurrent weight
                 b1_ref,     # (1, 4H)    layer-1 bias b_ih+b_hh
                 wfc_ref,    # (H, O)     final Linear weight
                 bfc_ref,    # (1, O)     final Linear bias
                 out_ref,    # (B, T)     lane-dense output slab
                 xproj_ref): # (T*B, 4H)  VMEM scratch for the input projection
    B, T = out_ref.shape
    H = HIDDEN_SIZE

    # ---- loop-invariant loads / broadcasts (hoisted out of the time loop) ----
    whh0 = whh0_ref[...]
    wih1 = wih1_ref[...]
    whh1 = whh1_ref[...]
    wfc = wfc_ref[...]
    b1 = jnp.broadcast_to(b1_ref[...], (B, 4 * H))

    # ---- pre-loop: layer-0 input projection for ALL timesteps, ONE matmul ----
    xproj_ref[...] = (
        jnp.dot(x_ref[...], wih0_ref[...], preferred_element_type=jnp.float32)
        + b0_ref[...])                                          # (T*B, 4H)

    def gates_to_hc(gates, c):
        # Gates packed (i, f, o, g): one contiguous 3H sigmoid + one tanh.
        s = _sigmoid(gates[:, 0:3 * H])
        i = s[:, 0 * H:1 * H]
        f = s[:, 1 * H:2 * H]
        o = s[:, 2 * H:3 * H]
        g = jnp.tanh(gates[:, 3 * H:4 * H])
        c_new = f * c + i * g
        h_new = o * jnp.tanh(c_new)
        return h_new, c_new

    zeros = jnp.zeros((B, H), jnp.float32)
    h0, c0, h1, c1 = zeros, zeros, zeros, zeros   # PyTorch default h0 = c0 = 0
    h1_steps = []

    # Fully-unrolled sequential recurrence (T is small & static); states live
    # in vector registers.  Only recurrent matmuls remain on the serial path.
    for t in range(T):
        # layer-1 recurrent dot depends only on h1(t-1): overlaps layer-0.
        g1_rec = jnp.dot(h1, whh1, preferred_element_type=jnp.float32)

        # layer 0: input projection was precomputed; only the recurrent matmul.
        g0 = xproj_ref[t * B:(t + 1) * B, :] + jnp.dot(
            h0, whh0, preferred_element_type=jnp.float32)
        h0, c0 = gates_to_hc(g0, c0)

        # layer 1: two dots (no per-step lane concat).
        g1 = g1_rec + jnp.dot(h0, wih1, preferred_element_type=jnp.float32) + b1
        h1, c1 = gates_to_hc(g1, c1)
        h1_steps.append(h1)

    # ---- post-loop: final Linear hoisted off the recurrence, single store ----
    # OUTPUT_SIZE == 1, so each per-step projection is one lane; concatenating
    # them along lanes yields the lane-dense (B, T) slab, written exactly once.
    ys = [jnp.dot(h, wfc, preferred_element_type=jnp.float32) for h in h1_steps]
    bias = jnp.broadcast_to(bfc_ref[...], (B, OUTPUT_SIZE))
    out_ref[...] = (jnp.concatenate(ys, axis=1) + bias).astype(out_ref.dtype)


@jax.jit
def lstm_model_forward(x, packed_params):
    """x: (B, T, INPUT_SIZE) batch-first float32. Returns (B, T, OUTPUT_SIZE).

    `packed_params` must come from `pack_params` (gate columns in i,f,o,g order).
    """
    (wih0, b0, whh0, wih1, whh1, b1, wfc, bfc) = packed_params
    B, T, _ = x.shape

    # Time-major flatten (tiny copy, ~3 KB) so the kernel's pre-loop projection
    # is one dense (T*B, I) matmul and per-step slices are sublane-contiguous.
    x_tm = jnp.transpose(x, (1, 0, 2)).reshape(T * B, INPUT_SIZE)

    vmem = lambda: pl.BlockSpec(memory_space=pltpu.MemorySpace.VMEM)

    out = pl.pallas_call(
        _lstm_kernel,
        out_shape=jax.ShapeDtypeStruct((B, T), jnp.float32),
        in_specs=[vmem() for _ in range(9)],
        out_specs=vmem(),
        scratch_shapes=[pltpu.VMEM((T * B, 4 * HIDDEN_SIZE), jnp.float32)],
    )(x_tm, wih0, b0, whh0, wih1, whh1, b1, wfc, bfc)

    return out[..., None]                                   # (B, T, OUTPUT_SIZE)


def init_params(key):
    """Deterministic init matching PyTorch shapes; weights stored pre-transposed
    to (in, 4H) with PyTorch gate order (i, f, g, o)."""
    H, I, O = HIDDEN_SIZE, INPUT_SIZE, OUTPUT_SIZE
    k_lstm = 1.0 / np.sqrt(H)
    k_fc = 1.0 / np.sqrt(H)
    keys = jax.random.split(key, 10)

    def u(k, shape, bound):
        return jax.random.uniform(k, shape, jnp.float32, -bound, bound)

    wih0 = u(keys[0], (I, 4 * H), k_lstm)
    whh0 = u(keys[1], (H, 4 * H), k_lstm)
    b0 = u(keys[2], (1, 4 * H), k_lstm) + u(keys[3], (1, 4 * H), k_lstm)  # b_ih + b_hh
    wih1 = u(keys[4], (H, 4 * H), k_lstm)
    whh1 = u(keys[5], (H, 4 * H), k_lstm)
    b1 = u(keys[6], (1, 4 * H), k_lstm) + u(keys[7], (1, 4 * H), k_lstm)
    wfc = u(keys[8], (H, O), k_fc)
    bfc = u(keys[9], (1, O), k_fc)
    return (wih0, whh0, b0, wih1, whh1, b1, wfc, bfc)


def pack_params(params):
    """One-time (outside jit) re-pack of gate columns from PyTorch (i, f, g, o)
    to kernel order (i, f, o, g), in kernel-operand order."""
    (wih0, whh0, b0, wih1, whh1, b1, wfc, bfc) = params
    H = HIDDEN_SIZE

    def repack(w):
        return jnp.concatenate(
            [w[..., 0:H], w[..., H:2 * H], w[..., 3 * H:4 * H], w[..., 2 * H:3 * H]],
            axis=-1)

    return (repack(wih0), repack(b0), repack(whh0),
            repack(wih1), repack(whh1), repack(b1), wfc, bfc)


def reference_forward(x, params):
    """Pure-JAX reference (mirrors torch.nn.LSTM + Linear semantics)."""
    (wih0, whh0, b0, wih1, whh1, b1, wfc, bfc) = params
    B, T, _ = x.shape
    H = HIDDEN_SIZE

    def cell(x_t, h, c, wih, whh, b):
        gates = x_t @ wih + h @ whh + b
        i = jax.nn.sigmoid(gates[:, 0 * H:1 * H])
        f = jax.nn.sigmoid(gates[:, 1 * H:2 * H])
        g = jnp.tanh(gates[:, 2 * H:3 * H])
        o = jax.nn.sigmoid(gates[:, 3 * H:4 * H])
        c_new = f * c + i * g
        h_new = o * jnp.tanh(c_new)
        return h_new, c_new

    def step(carry, x_t):
        h0, c0, h1, c1 = carry
        h0, c0 = cell(x_t, h0, c0, wih0, whh0, b0)
        h1, c1 = cell(h0, h1, c1, wih1, whh1, b1)
        y = h1 @ wfc + bfc
        return (h0, c0, h1, c1), y

    zeros = jnp.zeros((B, H), jnp.float32)
    _, ys = jax.lax.scan(step, (zeros, zeros, zeros, zeros),
                         jnp.transpose(x, (1, 0, 2)))
    return jnp.transpose(ys, (1, 0, 2))


if __name__ == "__main__":
    key = jax.random.PRNGKey(0)
    pkey, xkey = jax.random.split(key)
    params = init_params(pkey)
    packed = pack_params(params)   # one-time gate repack, outside jit

    # B = 8 fills a full f32 sublane tile (review: amortize per-step fixed cost).
    B, T = 8, 8
    x = jax.random.normal(xkey, (B, T, INPUT_SIZE), jnp.float32)

    out = jax.block_until_ready(lstm_model_forward(x, packed))
    ref = jax.block_until_ready(reference_forward(x, params))

    assert out.shape == (B, T, OUTPUT_SIZE), out.shape
    np.testing.assert_allclose(np.asarray(out), np.asarray(ref), atol=1e-4, rtol=1e-4)
    print("KERNEL_OK")
</pallas_src>

<mosaic_0001>
module attributes {stable_mosaic.version = 11 : i64} {
  func.func @_lstm_kernel(%arg0: memref<64x12xf32, #tpu.memory_space<vmem>>, %arg1: memref<12x256xf32, #tpu.memory_space<vmem>>, %arg2: memref<1x256xf32, #tpu.memory_space<vmem>>, %arg3: memref<64x256xf32, #tpu.memory_space<vmem>>, %arg4: memref<64x256xf32, #tpu.memory_space<vmem>>, %arg5: memref<64x256xf32, #tpu.memory_space<vmem>>, %arg6: memref<1x256xf32, #tpu.memory_space<vmem>>, %arg7: memref<64x1xf32, #tpu.memory_space<vmem>>, %arg8: memref<1x1xf32, #tpu.memory_space<vmem>>, %arg9: memref<8x8xf32, #tpu.memory_space<vmem>>, %arg10: memref<64x256xf32, #tpu.memory_space<vmem>>) attributes {dimension_semantics = [], scalar_prefetch = 0 : i64, scratch_operands = 1 : i64, tpu.core_type = #tpu.core_type<tc>} {
    %c0 = arith.constant 0 : index
    %c0_0 = arith.constant 0 : index
    %0 = vector.load %arg3[%c0, %c0_0] : memref<64x256xf32, #tpu.memory_space<vmem>>, vector<64x256xf32>
    %c0_1 = arith.constant 0 : index
    %c0_2 = arith.constant 0 : index
    %1 = vector.load %arg4[%c0_1, %c0_2] : memref<64x256xf32, #tpu.memory_space<vmem>>, vector<64x256xf32>
    %c0_3 = arith.constant 0 : index
    %c0_4 = arith.constant 0 : index
    %2 = vector.load %arg5[%c0_3, %c0_4] : memref<64x256xf32, #tpu.memory_space<vmem>>, vector<64x256xf32>
    %c0_5 = arith.constant 0 : index
    %c0_6 = arith.constant 0 : index
    %3 = vector.load %arg7[%c0_5, %c0_6] : memref<64x1xf32, #tpu.memory_space<vmem>>, vector<64x1xf32>
    %c0_7 = arith.constant 0 : index
    %c0_8 = arith.constant 0 : index
    %4 = vector.load %arg6[%c0_7, %c0_8] : memref<1x256xf32, #tpu.memory_space<vmem>>, vector<1x256xf32>
    %5 = vector.shape_cast %4 : vector<1x256xf32> to vector<1x256xf32>
    %6 = vector.broadcast %5 : vector<1x256xf32> to vector<8x256xf32>
    %c0_9 = arith.constant 0 : index
    %c0_10 = arith.constant 0 : index
    %7 = vector.load %arg0[%c0_9, %c0_10] : memref<64x12xf32, #tpu.memory_space<vmem>>, vector<64x12xf32>
    %c0_11 = arith.constant 0 : index
    %c0_12 = arith.constant 0 : index
    %8 = vector.load %arg1[%c0_11, %c0_12] : memref<12x256xf32, #tpu.memory_space<vmem>>, vector<12x256xf32>
    %cst = arith.constant dense<0.000000e+00> : vector<64x256xf32>
    %9 = tpu.matmul %7, %8, %cst {dimension_numbers = #tpu.dot_dimension_numbers<[1], [0], [0], [1], [0, 0, 1, 1], [], []>} : vector<64x12xf32>, vector<12x256xf32>, vector<64x256xf32> -> vector<64x256xf32>
    %c0_13 = arith.constant 0 : index
    %c0_14 = arith.constant 0 : index
    %10 = vector.load %arg2[%c0_13, %c0_14] : memref<1x256xf32, #tpu.memory_space<vmem>>, vector<1x256xf32>
    %11 = vector.broadcast %10 : vector<1x256xf32> to vector<64x256xf32>
    %12 = arith.addf %9, %11 : vector<64x256xf32>
    %c0_15 = arith.constant 0 : index
    %c0_16 = arith.constant 0 : index
    %13 = vector.load %arg10[%c0_15, %c0_16] : memref<64x256xf32, #tpu.memory_space<vmem>>, vector<64x256xf32>
    tpu.vector_store %arg10[%c0_15, %c0_16], %12 {strides = array<i32>} : memref<64x256xf32, #tpu.memory_space<vmem>>, vector<64x256xf32>,
    %cst_17 = arith.constant 0.000000e+00 : f32
    %14 = vector.broadcast %cst_17 : f32 to vector<8x64xf32>
    %cst_18 = arith.constant dense<0.000000e+00> : vector<8x256xf32>
    %15 = tpu.matmul %14, %2, %cst_18 {dimension_numbers = #tpu.dot_dimension_numbers<[1], [0], [0], [1], [0, 0, 1, 1], [], []>} : vector<8x64xf32>, vector<64x256xf32>, vector<8x256xf32> -> vector<8x256xf32>
    %c0_19 = arith.constant 0 : index
    %c0_20 = arith.constant 0 : index
    %16 = vector.load %arg10[%c0_19, %c0_20] : memref<64x256xf32, #tpu.memory_space<vmem>>, vector<8x256xf32>
    %cst_21 = arith.constant dense<0.000000e+00> : vector<8x256xf32>
    %17 = tpu.matmul %14, %0, %cst_21 {dimension_numbers = #tpu.dot_dimension_numbers<[1], [0], [0], [1], [0, 0, 1, 1], [], []>} : vector<8x64xf32>, vector<64x256xf32>, vector<8x256xf32> -> vector<8x256xf32>
    %18 = arith.addf %16, %17 : vector<8x256xf32>
    %19 = vector.extract_strided_slice %18 {offsets = [0, 0], sizes = [8, 192], strides = [1, 1]} : vector<8x256xf32> to vector<8x192xf32>
    %cst_22 = arith.constant 5.000000e-01 : f32
    %20 = vector.broadcast %cst_22 : f32 to vector<8x192xf32>
    %21 = arith.mulf %20, %19 : vector<8x192xf32>
    %22 = math.tanh %21 : vector<8x192xf32>
    %cst_23 = arith.constant 5.000000e-01 : f32
    %23 = vector.broadcast %cst_23 : f32 to vector<8x192xf32>
    %24 = arith.mulf %23, %22 : vector<8x192xf32>
    %cst_24 = arith.constant 5.000000e-01 : f32
    %25 = vector.broadcast %cst_24 : f32 to vector<8x192xf32>
    %26 = arith.addf %24, %25 : vector<8x192xf32>
    %27 = vector.extract_strided_slice %26 {offsets = [0, 0], sizes = [8, 64], strides = [1, 1]} : vector<8x192xf32> to vector<8x64xf32>
    %28 = vector.extract_strided_slice %26 {offsets = [0, 64], sizes = [8, 64], strides = [1, 1]} : vector<8x192xf32> to vector<8x64xf32>
    %29 = vector.extract_strided_slice %26 {offsets = [0, 128], sizes = [8, 64], strides = [1, 1]} : vector<8x192xf32> to vector<8x64xf32>
    %30 = vector.extract_strided_slice %18 {offsets = [0, 192], sizes = [8, 64], strides = [1, 1]} : vector<8x256xf32> to vector<8x64xf32>
    %31 = math.tanh %30 : vector<8x64xf32>
    %32 = arith.mulf %28, %14 : vector<8x64xf32>
    %33 = arith.mulf %27, %31 : vector<8x64xf32>
    %34 = arith.addf %32, %33 : vector<8x64xf32>
    %35 = math.tanh %34 : vector<8x64xf32>
    %36 = arith.mulf %29, %35 : vector<8x64xf32>
    %cst_25 = arith.constant dense<0.000000e+00> : vector<8x256xf32>
    %37 = tpu.matmul %36, %1, %cst_25 {dimension_numbers = #tpu.dot_dimension_numbers<[1], [0], [0], [1], [0, 0, 1, 1], [], []>} : vector<8x64xf32>, vector<64x256xf32>, vector<8x256xf32> -> vector<8x256xf32>
    %38 = arith.addf %15, %37 : vector<8x256xf32>
    %39 = arith.addf %38, %6 : vector<8x256xf32>
    %40 = vector.extract_strided_slice %39 {offsets = [0, 0], sizes = [8, 192], strides = [1, 1]} : vector<8x256xf32> to vector<8x192xf32>
    %cst_26 = arith.constant 5.000000e-01 : f32
    %41 = vector.broadcast %cst_26 : f32 to vector<8x192xf32>
    %42 = arith.mulf %41, %40 : vector<8x192xf32>
    %43 = math.tanh %42 : vector<8x192xf32>
    %cst_27 = arith.constant 5.000000e-01 : f32
    %44 = vector.broadcast %cst_27 : f32 to vector<8x192xf32>
    %45 = arith.mulf %44, %43 : vector<8x192xf32>
    %cst_28 = arith.constant 5.000000e-01 : f32
    %46 = vector.broadcast %cst_28 : f32 to vector<8x192xf32>
    %47 = arith.addf %45, %46 : vector<8x192xf32>
    %48 = vector.extract_strided_slice %47 {offsets = [0, 0], sizes = [8, 64], strides = [1, 1]} : vector<8x192xf32> to vector<8x64xf32>
    %49 = vector.extract_strided_slice %47 {offsets = [0, 64], sizes = [8, 64], strides = [1, 1]} : vector<8x192xf32> to vector<8x64xf32>
    %50 = vector.extract_strided_slice %47 {offsets = [0, 128], sizes = [8, 64], strides = [1, 1]} : vector<8x192xf32> to vector<8x64xf32>
    %51 = vector.extract_strided_slice %39 {offsets = [0, 192], sizes = [8, 64], strides = [1, 1]} : vector<8x256xf32> to vector<8x64xf32>
    %52 = math.tanh %51 : vector<8x64xf32>
    %53 = arith.mulf %49, %14 : vector<8x64xf32>
    %54 = arith.mulf %48, %52 : vector<8x64xf32>
    %55 = arith.addf %53, %54 : vector<8x64xf32>
    %56 = math.tanh %55 : vector<8x64xf32>
    %57 = arith.mulf %50, %56 : vector<8x64xf32>
    %cst_29 = arith.constant dense<0.000000e+00> : vector<8x256xf32>
    %58 = tpu.matmul %57, %2, %cst_29 {dimension_numbers = #tpu.dot_dimension_numbers<[1], [0], [0], [1], [0, 0, 1, 1], [], []>} : vector<8x64xf32>, vector<64x256xf32>, vector<8x256xf32> -> vector<8x256xf32>
    %c8 = arith.constant 8 : index
    %c0_30 = arith.constant 0 : index
    %59 = vector.load %arg10[%c8, %c0_30] : memref<64x256xf32, #tpu.memory_space<vmem>>, vector<8x256xf32>
    %cst_31 = arith.constant dense<0.000000e+00> : vector<8x256xf32>
    %60 = tpu.matmul %36, %0, %cst_31 {dimension_numbers = #tpu.dot_dimension_numbers<[1], [0], [0], [1], [0, 0, 1, 1], [], []>} : vector<8x64xf32>, vector<64x256xf32>, vector<8x256xf32> -> vector<8x256xf32>
    %61 = arith.addf %59, %60 : vector<8x256xf32>
    %62 = vector.extract_strided_slice %61 {offsets = [0, 0], sizes = [8, 192], strides = [1, 1]} : vector<8x256xf32> to vector<8x192xf32>
    %cst_32 = arith.constant 5.000000e-01 : f32
    %63 = vector.broadcast %cst_32 : f32 to vector<8x192xf32>
    %64 = arith.mulf %63, %62 : vector<8x192xf32>
    %65 = math.tanh %64 : vector<8x192xf32>
    %cst_33 = arith.constant 5.000000e-01 : f32
    %66 = vector.broadcast %cst_33 : f32 to vector<8x192xf32>
    %67 = arith.mulf %66, %65 : vector<8x192xf32>
    %cst_34 = arith.constant 5.000000e-01 : f32
    %68 = vector.broadcast %cst_34 : f32 to vector<8x192xf32>
    %69 = arith.addf %67, %68 : vector<8x192xf32>
    %70 = vector.extract_strided_slice %69 {offsets = [0, 0], sizes = [8, 64], strides = [1, 1]} : vector<8x192xf32> to vector<8x64xf32>
    %71 = vector.extract_strided_slice %69 {offsets = [0, 64], sizes = [8, 64], strides = [1, 1]} : vector<8x192xf32> to vector<8x64xf32>
    %72 = vector.extract_strided_slice %69 {offsets = [0, 128], sizes = [8, 64], strides = [1, 1]} : vector<8x192xf32> to vector<8x64xf32>
    %73 = vector.extract_strided_slice %61 {offsets = [0, 192], sizes = [8, 64], strides = [1, 1]} : vector<8x256xf32> to vector<8x64xf32>
    %74 = math.tanh %73 : vector<8x64xf32>
    %75 = arith.mulf %71, %34 : vector<8x64xf32>
    %76 = arith.mulf %70, %74 : vector<8x64xf32>
    %77 = arith.addf %75, %76 : vector<8x64xf32>
    %78 = math.tanh %77 : vector<8x64xf32>
    %79 = arith.mulf %72, %78 : vector<8x64xf32>
    %cst_35 = arith.constant dense<0.000000e+00> : vector<8x256xf32>
    %80 = tpu.matmul %79, %1, %cst_35 {dimension_numbers = #tpu.dot_dimension_numbers<[1], [0], [0], [1], [0, 0, 1, 1], [], []>} : vector<8x64xf32>, vector<64x256xf32>, vector<8x256xf32> -> vector<8x256xf32>
    %81 = arith.addf %58, %80 : vector<8x256xf32>
    %82 = arith.addf %81, %6 : vector<8x256xf32>
    %83 = vector.extract_strided_slice %82 {offsets = [0, 0], sizes = [8, 192], strides = [1, 1]} : vector<8x256xf32> to vector<8x192xf32>
    %cst_36 = arith.constant 5.000000e-01 : f32
    %84 = vector.broadcast %cst_36 : f32 to vector<8x192xf32>
    %85 = arith.mulf %84, %83 : vector<8x192xf32>
    %86 = math.tanh %85 : vector<8x192xf32>
    %cst_37 = arith.constant 5.000000e-01 : f32
    %87 = vector.broadcast %cst_37 : f32 to vector<8x192xf32>
    %88 = arith.mulf %87, %86 : vector<8x192xf32>
    %cst_38 = arith.constant 5.000000e-01 : f32
    %89 = vector.broadcast %cst_38 : f32 to vector<8x192xf32>
    %90 = arith.addf %88, %89 : vector<8x192xf32>
    %91 = vector.extract_strided_slice %90 {offsets = [0, 0], sizes = [8, 64], strides = [1, 1]} : vector<8x192xf32> to vector<8x64xf32>
    %92 = vector.extract_strided_slice %90 {offsets = [0, 64], sizes = [8, 64], strides = [1, 1]} : vector<8x192xf32> to vector<8x64xf32>
    %93 = vector.extract_strided_slice %90 {offsets = [0, 128], sizes = [8, 64], strides = [1, 1]} : vector<8x192xf32> to vector<8x64xf32>
    %94 = vector.extract_strided_slice %82 {offsets = [0, 192], sizes = [8, 64], strides = [1, 1]} : vector<8x256xf32> to vector<8x64xf32>
    %95 = math.tanh %94 : vector<8x64xf32>
    %96 = arith.mulf %92, %55 : vector<8x64xf32>
    %97 = arith.mulf %91, %95 : vector<8x64xf32>
    %98 = arith.addf %96, %97 : vector<8x64xf32>
    %99 = math.tanh %98 : vector<8x64xf32>
    %100 = arith.mulf %93, %99 : vector<8x64xf32>
    %cst_39 = arith.constant dense<0.000000e+00> : vector<8x256xf32>
    %101 = tpu.matmul %100, %2, %cst_39 {dimension_numbers = #tpu.dot_dimension_numbers<[1], [0], [0], [1], [0, 0, 1, 1], [], []>} : vector<8x64xf32>, vector<64x256xf32>, vector<8x256xf32> -> vector<8x256xf32>
    %c16 = arith.constant 16 : index
    %c0_40 = arith.constant 0 : index
    %102 = vector.load %arg10[%c16, %c0_40] : memref<64x256xf32, #tpu.memory_space<vmem>>, vector<8x256xf32>
    %cst_41 = arith.constant dense<0.000000e+00> : vector<8x256xf32>
    %103 = tpu.matmul %79, %0, %cst_41 {dimension_numbers = #tpu.dot_dimension_numbers<[1], [0], [0], [1], [0, 0, 1, 1], [], []>} : vector<8x64xf32>, vector<64x256xf32>, vector<8x256xf32> -> vector<8x256xf32>
    %104 = arith.addf %102, %103 : vector<8x256xf32>
    %105 = vector.extract_strided_slice %104 {offsets = [0, 0], sizes = [8, 192], strides = [1, 1]} : vector<8x256xf32> to vector<8x192xf32>
    %cst_42 = arith.constant 5.000000e-01 : f32
    %106 = vector.broadcast %cst_42 : f32 to vector<8x192xf32>
    %107 = arith.mulf %106, %105 : vector<8x192xf32>
    %108 = math.tanh %107 : vector<8x192xf32>
    %cst_43 = arith.constant 5.000000e-01 : f32
    %109 = vector.broadcast %cst_43 : f32 to vector<8x192xf32>
    %110 = arith.mulf %109, %108 : vector<8x192xf32>
    %cst_44 = arith.constant 5.000000e-01 : f32
    %111 = vector.broadcast %cst_44 : f32 to vector<8x192xf32>
    %112 = arith.addf %110, %111 : vector<8x192xf32>
    %113 = vector.extract_strided_slice %112 {offsets = [0, 0], sizes = [8, 64], strides = [1, 1]} : vector<8x192xf32> to vector<8x64xf32>
    %114 = vector.extract_strided_slice %112 {offsets = [0, 64], sizes = [8, 64], strides = [1, 1]} : vector<8x192xf32> to vector<8x64xf32>
    %115 = vector.extract_strided_slice %112 {offsets = [0, 128], sizes = [8, 64], strides = [1, 1]} : vector<8x192xf32> to vector<8x64xf32>
    %116 = vector.extract_strided_slice %104 {offsets = [0, 192], sizes = [8, 64], strides = [1, 1]} : vector<8x256xf32> to vector<8x64xf32>
    %117 = math.tanh %116 : vector<8x64xf32>
    %118 = arith.mulf %114, %77 : vector<8x64xf32>
    %119 = arith.mulf %113, %117 : vector<8x64xf32>
    %120 = arith.addf %118, %119 : vector<8x64xf32>
    %121 = math.tanh %120 : vector<8x64xf32>
    %122 = arith.mulf %115, %121 : vector<8x64xf32>
    %cst_45 = arith.constant dense<0.000000e+00> : vector<8x256xf32>
    %123 = tpu.matmul %122, %1, %cst_45 {dimension_numbers = #tpu.dot_dimension_numbers<[1], [0], [0], [1], [0, 0, 1, 1], [], []>} : vector<8x64xf32>, vector<64x256xf32>, vector<8x256xf32> -> vector<8x256xf32>
    %124 = arith.addf %101, %123 : vector<8x256xf32>
    %125 = arith.addf %124, %6 : vector<8x256xf32>
    %126 = vector.extract_strided_slice %125 {offsets = [0, 0], sizes = [8, 192], strides = [1, 1]} : vector<8x256xf32> to vector<8x192xf32>
    %cst_46 = arith.constant 5.000000e-01 : f32
    %127 = vector.broadcast %cst_46 : f32 to vector<8x192xf32>
    %128 = arith.mulf %127, %126 : vector<8x192xf32>
    %129 = math.tanh %128 : vector<8x192xf32>
    %cst_47 = arith.constant 5.000000e-01 : f32
    %130 = vector.broadcast %cst_47 : f32 to vector<8x192xf32>
    %131 = arith.mulf %130, %129 : vector<8x192xf32>
    %cst_48 = arith.constant 5.000000e-01 : f32
    %132 = vector.broadcast %cst_48 : f32 to vector<8x192xf32>
    %133 = arith.addf %131, %132 : vector<8x192xf32>
    %134 = vector.extract_strided_slice %133 {offsets = [0, 0], sizes = [8, 64], strides = [1, 1]} : vector<8x192xf32> to vector<8x64xf32>
    %135 = vector.extract_strided_slice %133 {offsets = [0, 64], sizes = [8, 64], strides = [1, 1]} : vector<8x192xf32> to vector<8x64xf32>
    %136 = vector.extract_strided_slice %133 {offsets = [0, 128], sizes = [8, 64], strides = [1, 1]} : vector<8x192xf32> to vector<8x64xf32>
    %137 = vector.extract_strided_slice %125 {offsets = [0, 192], sizes = [8, 64], strides = [1, 1]} : vector<8x256xf32> to vector<8x64xf32>
    %138 = math.tanh %137 : vector<8x64xf32>
    %139 = arith.mulf %135, %98 : vector<8x64xf32>
    %140 = arith.mulf %134, %138 : vector<8x64xf32>
    %141 = arith.addf %139, %140 : vector<8x64xf32>
    %142 = math.tanh %141 : vector<8x64xf32>
    %143 = arith.mulf %136, %142 : vector<8x64xf32>
    %cst_49 = arith.constant dense<0.000000e+00> : vector<8x256xf32>
    %144 = tpu.matmul %143, %2, %cst_49 {dimension_numbers = #tpu.dot_dimension_numbers<[1], [0], [0], [1], [0, 0, 1, 1], [], []>} : vector<8x64xf32>, vector<64x256xf32>, vector<8x256xf32> -> vector<8x256xf32>
    %c24 = arith.constant 24 : index
    %c0_50 = arith.constant 0 : index
    %145 = vector.load %arg10[%c24, %c0_50] : memref<64x256xf32, #tpu.memory_space<vmem>>, vector<8x256xf32>
    %cst_51 = arith.constant dense<0.000000e+00> : vector<8x256xf32>
    %146 = tpu.matmul %122, %0, %cst_51 {dimension_numbers = #tpu.dot_dimension_numbers<[1], [0], [0], [1], [0, 0, 1, 1], [], []>} : vector<8x64xf32>, vector<64x256xf32>, vector<8x256xf32> -> vector<8x256xf32>
    %147 = arith.addf %145, %146 : vector<8x256xf32>
    %148 = vector.extract_strided_slice %147 {offsets = [0, 0], sizes = [8, 192], strides = [1, 1]} : vector<8x256xf32> to vector<8x192xf32>
    %cst_52 = arith.constant 5.000000e-01 : f32
    %149 = vector.broadcast %cst_52 : f32 to vector<8x192xf32>
    %150 = arith.mulf %149, %148 : vector<8x192xf32>
    %151 = math.tanh %150 : vector<8x192xf32>
    %cst_53 = arith.constant 5.000000e-01 : f32
    %152 = vector.broadcast %cst_53 : f32 to vector<8x192xf32>
    %153 = arith.mulf %152, %151 : vector<8x192xf32>
    %cst_54 = arith.constant 5.000000e-01 : f32
    %154 = vector.broadcast %cst_54 : f32 to vector<8x192xf32>
    %155 = arith.addf %153, %154 : vector<8x192xf32>
    %156 = vector.extract_strided_slice %155 {offsets = [0, 0], sizes = [8, 64], strides = [1, 1]} : vector<8x192xf32> to vector<8x64xf32>
    %157 = vector.extract_strided_slice %155 {offsets = [0, 64], sizes = [8, 64], strides = [1, 1]} : vector<8x192xf32> to vector<8x64xf32>
    %158 = vector.extract_strided_slice %155 {offsets = [0, 128], sizes = [8, 64], strides = [1, 1]} : vector<8x192xf32> to vector<8x64xf32>
    %159 = vector.extract_strided_slice %147 {offsets = [0, 192], sizes = [8, 64], strides = [1, 1]} : vector<8x256xf32> to vector<8x64xf32>
    %160 = math.tanh %159 : vector<8x64xf32>
    %161 = arith.mulf %157, %120 : vector<8x64xf32>
    %162 = arith.mulf %156, %160 : vector<8x64xf32>
    %163 = arith.addf %161, %162 : vector<8x64xf32>
    %164 = math.tanh %163 : vector<8x64xf32>
    %165 = arith.mulf %158, %164 : vector<8x64xf32>
    %cst_55 = arith.constant dense<0.000000e+00> : vector<8x256xf32>
    %166 = tpu.matmul %165, %1, %cst_55 {dimension_numbers = #tpu.dot_dimension_numbers<[1], [0], [0], [1], [0, 0, 1, 1], [], []>} : vector<8x64xf32>, vector<64x256xf32>, vector<8x256xf32> -> vector<8x256xf32>
    %167 = arith.addf %144, %166 : vector<8x256xf32>
    %168 = arith.addf %167, %6 : vector<8x256xf32>
    %169 = vector.extract_strided_slice %168 {offsets = [0, 0], sizes = [8, 192], strides = [1, 1]} : vector<8x256xf32> to vector<8x192xf32>
    %cst_56 = arith.constant 5.000000e-01 : f32
    %170 = vector.broadcast %cst_56 : f32 to vector<8x192xf32>
    %171 = arith.mulf %170, %169 : vector<8x192xf32>
    %172 = math.tanh %171 : vector<8x192xf32>
    %cst_57 = arith.constant 5.000000e-01 : f32
    %173 = vector.broadcast %cst_57 : f32 to vector<8x192xf32>
    %174 = arith.mulf %173, %172 : vector<8x192xf32>
    %cst_58 = arith.constant 5.000000e-01 : f32
    %175 = vector.broadcast %cst_58 : f32 to vector<8x192xf32>
    %176 = arith.addf %174, %175 : vector<8x192xf32>
    %177 = vector.extract_strided_slice %176 {offsets = [0, 0], sizes = [8, 64], strides = [1, 1]} : vector<8x192xf32> to vector<8x64xf32>
    %178 = vector.extract_strided_slice %176 {offsets = [0, 64], sizes = [8, 64], strides = [1, 1]} : vector<8x192xf32> to vector<8x64xf32>
    %179 = vector.extract_strided_slice %176 {offsets = [0, 128], sizes = [8, 64], strides = [1, 1]} : vector<8x192xf32> to vector<8x64xf32>
    %180 = vector.extract_strided_slice %168 {offsets = [0, 192], sizes = [8, 64], strides = [1, 1]} : vector<8x256xf32> to vector<8x64xf32>
    %181 = math.tanh %180 : vector<8x64xf32>
    %182 = arith.mulf %178, %141 : vector<8x64xf32>
    %183 = arith.mulf %177, %181 : vector<8x64xf32>
    %184 = arith.addf %182, %183 : vector<8x64xf32>
    %185 = math.tanh %184 : vector<8x64xf32>
    %186 = arith.mulf %179, %185 : vector<8x64xf32>
    %cst_59 = arith.constant dense<0.000000e+00> : vector<8x256xf32>
    %187 = tpu.matmul %186, %2, %cst_59 {dimension_numbers = #tpu.dot_dimension_numbers<[1], [0], [0], [1], [0, 0, 1, 1], [], []>} : vector<8x64xf32>, vector<64x256xf32>, vector<8x256xf32> -> vector<8x256xf32>
    %c32 = arith.constant 32 : index
    %c0_60 = arith.constant 0 : index
    %188 = vector.load %arg10[%c32, %c0_60] : memref<64x256xf32, #tpu.memory_space<vmem>>, vector<8x256xf32>
    %cst_61 = arith.constant dense<0.000000e+00> : vector<8x256xf32>
    %189 = tpu.matmul %165, %0, %cst_61 {dimension_numbers = #tpu.dot_dimension_numbers<[1], [0], [0], [1], [0, 0, 1, 1], [], []>} : vector<8x64xf32>, vector<64x256xf32>, vector<8x256xf32> -> vector<8x256xf32>
    %190 = arith.addf %188, %189 : vector<8x256xf32>
    %191 = vector.extract_strided_slice %190 {offsets = [0, 0], sizes = [8, 192], strides = [1, 1]} : vector<8x256xf32> to vector<8x192xf32>
    %cst_62 = arith.constant 5.000000e-01 : f32
    %192 = vector.broadcast %cst_62 : f32 to vector<8x192xf32>
    %193 = arith.mulf %192, %191 : vector<8x192xf32>
    %194 = math.tanh %193 : vector<8x192xf32>
    %cst_63 = arith.constant 5.000000e-01 : f32
    %195 = vector.broadcast %cst_63 : f32 to vector<8x192xf32>
    %196 = arith.mulf %195, %194 : vector<8x192xf32>
    %cst_64 = arith.constant 5.000000e-01 : f32
    %197 = vector.broadcast %cst_64 : f32 to vector<8x192xf32>
    %198 = arith.addf %196, %197 : vector<8x192xf32>
    %199 = vector.extract_strided_slice %198 {offsets = [0, 0], sizes = [8, 64], strides = [1, 1]} : vector<8x192xf32> to vector<8x64xf32>
    %200 = vector.extract_strided_slice %198 {offsets = [0, 64], sizes = [8, 64], strides = [1, 1]} : vector<8x192xf32> to vector<8x64xf32>
    %201 = vector.extract_strided_slice %198 {offsets = [0, 128], sizes = [8, 64], strides = [1, 1]} : vector<8x192xf32> to vector<8x64xf32>
    %202 = vector.extract_strided_slice %190 {offsets = [0, 192], sizes = [8, 64], strides = [1, 1]} : vector<8x256xf32> to vector<8x64xf32>
    %203 = math.tanh %202 : vector<8x64xf32>
    %204 = arith.mulf %200, %163 : vector<8x64xf32>
    %205 = arith.mulf %199, %203 : vector<8x64xf32>
    %206 = arith.addf %204, %205 : vector<8x64xf32>
    %207 = math.tanh %206 : vector<8x64xf32>
    %208 = arith.mulf %201, %207 : vector<8x64xf32>
    %cst_65 = arith.constant dense<0.000000e+00> : vector<8x256xf32>
    %209 = tpu.matmul %208, %1, %cst_65 {dimension_numbers = #tpu.dot_dimension_numbers<[1], [0], [0], [1], [0, 0, 1, 1], [], []>} : vector<8x64xf32>, vector<64x256xf32>, vector<8x256xf32> -> vector<8x256xf32>
    %210 = arith.addf %187, %209 : vector<8x256xf32>
    %211 = arith.addf %210, %6 : vector<8x256xf32>
    %212 = vector.extract_strided_slice %211 {offsets = [0, 0], sizes = [8, 192], strides = [1, 1]} : vector<8x256xf32> to vector<8x192xf32>
    %cst_66 = arith.constant 5.000000e-01 : f32
    %213 = vector.broadcast %cst_66 : f32 to vector<8x192xf32>
    %214 = arith.mulf %213, %212 : vector<8x192xf32>
    %215 = math.tanh %214 : vector<8x192xf32>
    %cst_67 = arith.constant 5.000000e-01 : f32
    %216 = vector.broadcast %cst_67 : f32 to vector<8x192xf32>
    %217 = arith.mulf %216, %215 : vector<8x192xf32>
    %cst_68 = arith.constant 5.000000e-01 : f32
    %218 = vector.broadcast %cst_68 : f32 to vector<8x192xf32>
    %219 = arith.addf %217, %218 : vector<8x192xf32>
    %220 = vector.extract_strided_slice %219 {offsets = [0, 0], sizes = [8, 64], strides = [1, 1]} : vector<8x192xf32> to vector<8x64xf32>
    %221 = vector.extract_strided_slice %219 {offsets = [0, 64], sizes = [8, 64], strides = [1, 1]} : vector<8x192xf32> to vector<8x64xf32>
    %222 = vector.extract_strided_slice %219 {offsets = [0, 128], sizes = [8, 64], strides = [1, 1]} : vector<8x192xf32> to vector<8x64xf32>
    %223 = vector.extract_strided_slice %211 {offsets = [0, 192], sizes = [8, 64], strides = [1, 1]} : vector<8x256xf32> to vector<8x64xf32>
    %224 = math.tanh %223 : vector<8x64xf32>
    %225 = arith.mulf %221, %184 : vector<8x64xf32>
    %226 = arith.mulf %220, %224 : vector<8x64xf32>
    %227 = arith.addf %225, %226 : vector<8x64xf32>
    %228 = math.tanh %227 : vector<8x64xf32>
    %229 = arith.mulf %222, %228 : vector<8x64xf32>
    %cst_69 = arith.constant dense<0.000000e+00> : vector<8x256xf32>
    %230 = tpu.matmul %229, %2, %cst_69 {dimension_numbers = #tpu.dot_dimension_numbers<[1], [0], [0], [1], [0, 0, 1, 1], [], []>} : vector<8x64xf32>, vector<64x256xf32>, vector<8x256xf32> -> vector<8x256xf32>
    %c40 = arith.constant 40 : index
    %c0_70 = arith.constant 0 : index
    %231 = vector.load %arg10[%c40, %c0_70] : memref<64x256xf32, #tpu.memory_space<vmem>>, vector<8x256xf32>
    %cst_71 = arith.constant dense<0.000000e+00> : vector<8x256xf32>
    %232 = tpu.matmul %208, %0, %cst_71 {dimension_numbers = #tpu.dot_dimension_numbers<[1], [0], [0], [1], [0, 0, 1, 1], [], []>} : vector<8x64xf32>, vector<64x256xf32>, vector<8x256xf32> -> vector<8x256xf32>
    %233 = arith.addf %231, %232 : vector<8x256xf32>
    %234 = vector.extract_strided_slice %233 {offsets = [0, 0], sizes = [8, 192], strides = [1, 1]} : vector<8x256xf32> to vector<8x192xf32>
    %cst_72 = arith.constant 5.000000e-01 : f32
    %235 = vector.broadcast %cst_72 : f32 to vector<8x192xf32>
    %236 = arith.mulf %235, %234 : vector<8x192xf32>
    %237 = math.tanh %236 : vector<8x192xf32>
    %cst_73 = arith.constant 5.000000e-01 : f32
    %238 = vector.broadcast %cst_73 : f32 to vector<8x192xf32>
    %239 = arith.mulf %238, %237 : vector<8x192xf32>
    %cst_74 = arith.constant 5.000000e-01 : f32
    %240 = vector.broadcast %cst_74 : f32 to vector<8x192xf32>
    %241 = arith.addf %239, %240 : vector<8x192xf32>
    %242 = vector.extract_strided_slice %241 {offsets = [0, 0], sizes = [8, 64], strides = [1, 1]} : vector<8x192xf32> to vector<8x64xf32>
    %243 = vector.extract_strided_slice %241 {offsets = [0, 64], sizes = [8, 64], strides = [1, 1]} : vector<8x192xf32> to vector<8x64xf32>
    %244 = vector.extract_strided_slice %241 {offsets = [0, 128], sizes = [8, 64], strides = [1, 1]} : vector<8x192xf32> to vector<8x64xf32>
    %245 = vector.extract_strided_slice %233 {offsets = [0, 192], sizes = [8, 64], strides = [1, 1]} : vector<8x256xf32> to vector<8x64xf32>
    %246 = math.tanh %245 : vector<8x64xf32>
    %247 = arith.mulf %243, %206 : vector<8x64xf32>
    %248 = arith.mulf %242, %246 : vector<8x64xf32>
    %249 = arith.addf %247, %248 : vector<8x64xf32>
    %250 = math.tanh %249 : vector<8x64xf32>
    %251 = arith.mulf %244, %250 : vector<8x64xf32>
    %cst_75 = arith.constant dense<0.000000e+00> : vector<8x256xf32>
    %252 = tpu.matmul %251, %1, %cst_75 {dimension_numbers = #tpu.dot_dimension_numbers<[1], [0], [0], [1], [0, 0, 1, 1], [], []>} : vector<8x64xf32>, vector<64x256xf32>, vector<8x256xf32> -> vector<8x256xf32>
    %253 = arith.addf %230, %252 : vector<8x256xf32>
    %254 = arith.addf %253, %6 : vector<8x256xf32>
    %255 = vector.extract_strided_slice %254 {offsets = [0, 0], sizes = [8, 192], strides = [1, 1]} : vector<8x256xf32> to vector<8x192xf32>
    %cst_76 = arith.constant 5.000000e-01 : f32
    %256 = vector.broadcast %cst_76 : f32 to vector<8x192xf32>
    %257 = arith.mulf %256, %255 : vector<8x192xf32>
    %258 = math.tanh %257 : vector<8x192xf32>
    %cst_77 = arith.constant 5.000000e-01 : f32
    %259 = vector.broadcast %cst_77 : f32 to vector<8x192xf32>
    %260 = arith.mulf %259, %258 : vector<8x192xf32>
    %cst_78 = arith.constant 5.000000e-01 : f32
    %261 = vector.broadcast %cst_78 : f32 to vector<8x192xf32>
    %262 = arith.addf %260, %261 : vector<8x192xf32>
    %263 = vector.extract_strided_slice %262 {offsets = [0, 0], sizes = [8, 64], strides = [1, 1]} : vector<8x192xf32> to vector<8x64xf32>
    %264 = vector.extract_strided_slice %262 {offsets = [0, 64], sizes = [8, 64], strides = [1, 1]} : vector<8x192xf32> to vector<8x64xf32>
    %265 = vector.extract_strided_slice %262 {offsets = [0, 128], sizes = [8, 64], strides = [1, 1]} : vector<8x192xf32> to vector<8x64xf32>
    %266 = vector.extract_strided_slice %254 {offsets = [0, 192], sizes = [8, 64], strides = [1, 1]} : vector<8x256xf32> to vector<8x64xf32>
    %267 = math.tanh %266 : vector<8x64xf32>
    %268 = arith.mulf %264, %227 : vector<8x64xf32>
    %269 = arith.mulf %263, %267 : vector<8x64xf32>
    %270 = arith.addf %268, %269 : vector<8x64xf32>
    %271 = math.tanh %270 : vector<8x64xf32>
    %272 = arith.mulf %265, %271 : vector<8x64xf32>
    %cst_79 = arith.constant dense<0.000000e+00> : vector<8x256xf32>
    %273 = tpu.matmul %272, %2, %cst_79 {dimension_numbers = #tpu.dot_dimension_numbers<[1], [0], [0], [1], [0, 0, 1, 1], [], []>} : vector<8x64xf32>, vector<64x256xf32>, vector<8x256xf32> -> vector<8x256xf32>
    %c48 = arith.constant 48 : index
    %c0_80 = arith.constant 0 : index
    %274 = vector.load %arg10[%c48, %c0_80] : memref<64x256xf32, #tpu.memory_space<vmem>>, vector<8x256xf32>
    %cst_81 = arith.constant dense<0.000000e+00> : vector<8x256xf32>
    %275 = tpu.matmul %251, %0, %cst_81 {dimension_numbers = #tpu.dot_dimension_numbers<[1], [0], [0], [1], [0, 0, 1, 1], [], []>} : vector<8x64xf32>, vector<64x256xf32>, vector<8x256xf32> -> vector<8x256xf32>
    %276 = arith.addf %274, %275 : vector<8x256xf32>
    %277 = vector.extract_strided_slice %276 {offsets = [0, 0], sizes = [8, 192], strides = [1, 1]} : vector<8x256xf32> to vector<8x192xf32>
    %cst_82 = arith.constant 5.000000e-01 : f32
    %278 = vector.broadcast %cst_82 : f32 to vector<8x192xf32>
    %279 = arith.mulf %278, %277 : vector<8x192xf32>
    %280 = math.tanh %279 : vector<8x192xf32>
    %cst_83 = arith.constant 5.000000e-01 : f32
    %281 = vector.broadcast %cst_83 : f32 to vector<8x192xf32>
    %282 = arith.mulf %281, %280 : vector<8x192xf32>
    %cst_84 = arith.constant 5.000000e-01 : f32
    %283 = vector.broadcast %cst_84 : f32 to vector<8x192xf32>
    %284 = arith.addf %282, %283 : vector<8x192xf32>
    %285 = vector.extract_strided_slice %284 {offsets = [0, 0], sizes = [8, 64], strides = [1, 1]} : vector<8x192xf32> to vector<8x64xf32>
    %286 = vector.extract_strided_slice %284 {offsets = [0, 64], sizes = [8, 64], strides = [1, 1]} : vector<8x192xf32> to vector<8x64xf32>
    %287 = vector.extract_strided_slice %284 {offsets = [0, 128], sizes = [8, 64], strides = [1, 1]} : vector<8x192xf32> to vector<8x64xf32>
    %288 = vector.extract_strided_slice %276 {offsets = [0, 192], sizes = [8, 64], strides = [1, 1]} : vector<8x256xf32> to vector<8x64xf32>
    %289 = math.tanh %288 : vector<8x64xf32>
    %290 = arith.mulf %286, %249 : vector<8x64xf32>
    %291 = arith.mulf %285, %289 : vector<8x64xf32>
    %292 = arith.addf %290, %291 : vector<8x64xf32>
    %293 = math.tanh %292 : vector<8x64xf32>
    %294 = arith.mulf %287, %293 : vector<8x64xf32>
    %cst_85 = arith.constant dense<0.000000e+00> : vector<8x256xf32>
    %295 = tpu.matmul %294, %1, %cst_85 {dimension_numbers = #tpu.dot_dimension_numbers<[1], [0], [0], [1], [0, 0, 1, 1], [], []>} : vector<8x64xf32>, vector<64x256xf32>, vector<8x256xf32> -> vector<8x256xf32>
    %296 = arith.addf %273, %295 : vector<8x256xf32>
    %297 = arith.addf %296, %6 : vector<8x256xf32>
    %298 = vector.extract_strided_slice %297 {offsets = [0, 0], sizes = [8, 192], strides = [1, 1]} : vector<8x256xf32> to vector<8x192xf32>
    %cst_86 = arith.constant 5.000000e-01 : f32
    %299 = vector.broadcast %cst_86 : f32 to vector<8x192xf32>
    %300 = arith.mulf %299, %298 : vector<8x192xf32>
    %301 = math.tanh %300 : vector<8x192xf32>
    %cst_87 = arith.constant 5.000000e-01 : f32
    %302 = vector.broadcast %cst_87 : f32 to vector<8x192xf32>
    %303 = arith.mulf %302, %301 : vector<8x192xf32>
    %cst_88 = arith.constant 5.000000e-01 : f32
    %304 = vector.broadcast %cst_88 : f32 to vector<8x192xf32>
    %305 = arith.addf %303, %304 : vector<8x192xf32>
    %306 = vector.extract_strided_slice %305 {offsets = [0, 0], sizes = [8, 64], strides = [1, 1]} : vector<8x192xf32> to vector<8x64xf32>
    %307 = vector.extract_strided_slice %305 {offsets = [0, 64], sizes = [8, 64], strides = [1, 1]} : vector<8x192xf32> to vector<8x64xf32>
    %308 = vector.extract_strided_slice %305 {offsets = [0, 128], sizes = [8, 64], strides = [1, 1]} : vector<8x192xf32> to vector<8x64xf32>
    %309 = vector.extract_strided_slice %297 {offsets = [0, 192], sizes = [8, 64], strides = [1, 1]} : vector<8x256xf32> to vector<8x64xf32>
    %310 = math.tanh %309 : vector<8x64xf32>
    %311 = arith.mulf %307, %270 : vector<8x64xf32>
    %312 = arith.mulf %306, %310 : vector<8x64xf32>
    %313 = arith.addf %311, %312 : vector<8x64xf32>
    %314 = math.tanh %313 : vector<8x64xf32>
    %315 = arith.mulf %308, %314 : vector<8x64xf32>
    %cst_89 = arith.constant dense<0.000000e+00> : vector<8x256xf32>
    %316 = tpu.matmul %315, %2, %cst_89 {dimension_numbers = #tpu.dot_dimension_numbers<[1], [0], [0], [1], [0, 0, 1, 1], [], []>} : vector<8x64xf32>, vector<64x256xf32>, vector<8x256xf32> -> vector<8x256xf32>
    %c56 = arith.constant 56 : index
    %c0_90 = arith.constant 0 : index
    %317 = vector.load %arg10[%c56, %c0_90] : memref<64x256xf32, #tpu.memory_space<vmem>>, vector<8x256xf32>
    %cst_91 = arith.constant dense<0.000000e+00> : vector<8x256xf32>
    %318 = tpu.matmul %294, %0, %cst_91 {dimension_numbers = #tpu.dot_dimension_numbers<[1], [0], [0], [1], [0, 0, 1, 1], [], []>} : vector<8x64xf32>, vector<64x256xf32>, vector<8x256xf32> -> vector<8x256xf32>
    %319 = arith.addf %317, %318 : vector<8x256xf32>
    %320 = vector.extract_strided_slice %319 {offsets = [0, 0], sizes = [8, 192], strides = [1, 1]} : vector<8x256xf32> to vector<8x192xf32>
    %cst_92 = arith.constant 5.000000e-01 : f32
    %321 = vector.broadcast %cst_92 : f32 to vector<8x192xf32>
    %322 = arith.mulf %321, %320 : vector<8x192xf32>
    %323 = math.tanh %322 : vector<8x192xf32>
    %cst_93 = arith.constant 5.000000e-01 : f32
    %324 = vector.broadcast %cst_93 : f32 to vector<8x192xf32>
    %325 = arith.mulf %324, %323 : vector<8x192xf32>
    %cst_94 = arith.constant 5.000000e-01 : f32
    %326 = vector.broadcast %cst_94 : f32 to vector<8x192xf32>
    %327 = arith.addf %325, %326 : vector<8x192xf32>
    %328 = vector.extract_strided_slice %327 {offsets = [0, 0], sizes = [8, 64], strides = [1, 1]} : vector<8x192xf32> to vector<8x64xf32>
    %329 = vector.extract_strided_slice %327 {offsets = [0, 64], sizes = [8, 64], strides = [1, 1]} : vector<8x192xf32> to vector<8x64xf32>
    %330 = vector.extract_strided_slice %327 {offsets = [0, 128], sizes = [8, 64], strides = [1, 1]} : vector<8x192xf32> to vector<8x64xf32>
    %331 = vector.extract_strided_slice %319 {offsets = [0, 192], sizes = [8, 64], strides = [1, 1]} : vector<8x256xf32> to vector<8x64xf32>
    %332 = math.tanh %331 : vector<8x64xf32>
    %333 = arith.mulf %329, %292 : vector<8x64xf32>
    %334 = arith.mulf %328, %332 : vector<8x64xf32>
    %335 = arith.addf %333, %334 : vector<8x64xf32>
    %336 = math.tanh %335 : vector<8x64xf32>
    %337 = arith.mulf %330, %336 : vector<8x64xf32>
    %cst_95 = arith.constant dense<0.000000e+00> : vector<8x256xf32>
    %338 = tpu.matmul %337, %1, %cst_95 {dimension_numbers = #tpu.dot_dimension_numbers<[1], [0], [0], [1], [0, 0, 1, 1], [], []>} : vector<8x64xf32>, vector<64x256xf32>, vector<8x256xf32> -> vector<8x256xf32>
    %339 = arith.addf %316, %338 : vector<8x256xf32>
    %340 = arith.addf %339, %6 : vector<8x256xf32>
    %341 = vector.extract_strided_slice %340 {offsets = [0, 0], sizes = [8, 192], strides = [1, 1]} : vector<8x256xf32> to vector<8x192xf32>
    %cst_96 = arith.constant 5.000000e-01 : f32
    %342 = vector.broadcast %cst_96 : f32 to vector<8x192xf32>
    %343 = arith.mulf %342, %341 : vector<8x192xf32>
    %344 = math.tanh %343 : vector<8x192xf32>
    %cst_97 = arith.constant 5.000000e-01 : f32
    %345 = vector.broadcast %cst_97 : f32 to vector<8x192xf32>
    %346 = arith.mulf %345, %344 : vector<8x192xf32>
    %cst_98 = arith.constant 5.000000e-01 : f32
    %347 = vector.broadcast %cst_98 : f32 to vector<8x192xf32>
    %348 = arith.addf %346, %347 : vector<8x192xf32>
    %349 = vector.extract_strided_slice %348 {offsets = [0, 0], sizes = [8, 64], strides = [1, 1]} : vector<8x192xf32> to vector<8x64xf32>
    %350 = vector.extract_strided_slice %348 {offsets = [0, 64], sizes = [8, 64], strides = [1, 1]} : vector<8x192xf32> to vector<8x64xf32>
    %351 = vector.extract_strided_slice %348 {offsets = [0, 128], sizes = [8, 64], strides = [1, 1]} : vector<8x192xf32> to vector<8x64xf32>
    %352 = vector.extract_strided_slice %340 {offsets = [0, 192], sizes = [8, 64], strides = [1, 1]} : vector<8x256xf32> to vector<8x64xf32>
    %353 = math.tanh %352 : vector<8x64xf32>
    %354 = arith.mulf %350, %313 : vector<8x64xf32>
    %355 = arith.mulf %349, %353 : vector<8x64xf32>
    %356 = arith.addf %354, %355 : vector<8x64xf32>
    %357 = math.tanh %356 : vector<8x64xf32>
    %358 = arith.mulf %351, %357 : vector<8x64xf32>
    %cst_99 = arith.constant dense<0.000000e+00> : vector<8x1xf32>
    %359 = tpu.matmul %57, %3, %cst_99 {dimension_numbers = #tpu.dot_dimension_numbers<[1], [0], [0], [1], [0, 0, 1, 1], [], []>} : vector<8x64xf32>, vector<64x1xf32>, vector<8x1xf32> -> vector<8x1xf32>
    %cst_100 = arith.constant dense<0.000000e+00> : vector<8x1xf32>
    %360 = tpu.matmul %100, %3, %cst_100 {dimension_numbers = #tpu.dot_dimension_numbers<[1], [0], [0], [1], [0, 0, 1, 1], [], []>} : vector<8x64xf32>, vector<64x1xf32>, vector<8x1xf32> -> vector<8x1xf32>
    %cst_101 = arith.constant dense<0.000000e+00> : vector<8x1xf32>
    %361 = tpu.matmul %143, %3, %cst_101 {dimension_numbers = #tpu.dot_dimension_numbers<[1], [0], [0], [1], [0, 0, 1, 1], [], []>} : vector<8x64xf32>, vector<64x1xf32>, vector<8x1xf32> -> vector<8x1xf32>
    %cst_102 = arith.constant dense<0.000000e+00> : vector<8x1xf32>
    %362 = tpu.matmul %186, %3, %cst_102 {dimension_numbers = #tpu.dot_dimension_numbers<[1], [0], [0], [1], [0, 0, 1, 1], [], []>} : vector<8x64xf32>, vector<64x1xf32>, vector<8x1xf32> -> vector<8x1xf32>
    %cst_103 = arith.constant dense<0.000000e+00> : vector<8x1xf32>
    %363 = tpu.matmul %229, %3, %cst_103 {dimension_numbers = #tpu.dot_dimension_numbers<[1], [0], [0], [1], [0, 0, 1, 1], [], []>} : vector<8x64xf32>, vector<64x1xf32>, vector<8x1xf32> -> vector<8x1xf32>
    %cst_104 = arith.constant dense<0.000000e+00> : vector<8x1xf32>
    %364 = tpu.matmul %272, %3, %cst_104 {dimension_numbers = #tpu.dot_dimension_numbers<[1], [0], [0], [1], [0, 0, 1, 1], [], []>} : vector<8x64xf32>, vector<64x1xf32>, vector<8x1xf32> -> vector<8x1xf32>
    %cst_105 = arith.constant dense<0.000000e+00> : vector<8x1xf32>
    %365 = tpu.matmul %315, %3, %cst_105 {dimension_numbers = #tpu.dot_dimension_numbers<[1], [0], [0], [1], [0, 0, 1, 1], [], []>} : vector<8x64xf32>, vector<64x1xf32>, vector<8x1xf32> -> vector<8x1xf32>
    %cst_106 = arith.constant dense<0.000000e+00> : vector<8x1xf32>
    %366 = tpu.matmul %358, %3, %cst_106 {dimension_numbers = #tpu.dot_dimension_numbers<[1], [0], [0], [1], [0, 0, 1, 1], [], []>} : vector<8x64xf32>, vector<64x1xf32>, vector<8x1xf32> -> vector<8x1xf32>
    %c0_107 = arith.constant 0 : index
    %c0_108 = arith.constant 0 : index
    %367 = vector.load %arg8[%c0_107, %c0_108] : memref<1x1xf32, #tpu.memory_space<vmem>>, vector<1x1xf32>
    %368 = vector.shape_cast %367 : vector<1x1xf32> to vector<1x1xf32>
    %369 = vector.broadcast %368 : vector<1x1xf32> to vector<8x1xf32>
    %370 = tpu.concatenate %359, %360, %361, %362, %363, %364, %365, %366 in 1 : vector<8x1xf32>, vector<8x1xf32>, vector<8x1xf32>, vector<8x1xf32>, vector<8x1xf32>, vector<8x1xf32>, vector<8x1xf32>, vector<8x1xf32> -> vector<8x8xf32>
    %371 = vector.broadcast %369 : vector<8x1xf32> to vector<8x8xf32>
    %372 = arith.addf %370, %371 : vector<8x8xf32>
    %c0_109 = arith.constant 0 : index
    %c0_110 = arith.constant 0 : index
    %373 = vector.load %arg9[%c0_109, %c0_110] : memref<8x8xf32, #tpu.memory_space<vmem>>, vector<8x8xf32>
    tpu.vector_store %arg9[%c0_109, %c0_110], %372 {strides = array<i32>} : memref<8x8xf32, #tpu.memory_space<vmem>>, vector<8x8xf32>,
    return
  }
}

</mosaic_0001>

<bundles_post_ra>
// kernel: lstm_model_forward.1
= control target key start
LH: loop header
LB: loop body
LE: loop exit
PB: predicated region body
PF: predicated region fallthrough
CT: control target
= control target key end

     0   :  { %s4971_s0 = inlined_call_operand.vmem [shape: f32[64,12], index: 0, kind: input, shape index: {}]   ;;  %s4972_s1 = inlined_call_operand.vmem [shape: f32[12,256], index: 1, kind: input, shape index: {}]   ;;  %s4973_s2 = inlined_call_operand.vmem [shape: f32[1,256], index: 2, kind: input, shape index: {}]   ;;  %s4974_s3 = inlined_call_operand.vmem [shape: f32[64,256], index: 3, kind: input, shape index: {}]   ;;  %s4975_s4 = inlined_call_operand.hbm [shape: f32[64,256], index: 4, kind: input, shape index: {}]   ;;  %s4976_s5 = inlined_call_operand.hbm [shape: f32[64,256], index: 5, kind: input, shape index: {}]   ;;  %s4977_s6 = inlined_call_operand.vmem [shape: f32[1,256], index: 6, kind: input, shape index: {}]   ;;  %s4978_s7 = inlined_call_operand.vmem [shape: f32[64,1], index: 7, kind: input, shape index: {}]   ;;  %s4979_s8 = inlined_call_operand.<no memory space> [shape: f32[1,1], index: 8, kind: input, shape index: {}]   ;;  %s4980_s9 = inlined_call_operand.hbm [shape: f32[8,8], index: 9, kind: output, shape index: {}]  }
   0x1   :  { %v14_v0 = vstv %s4979_s8 }
   0x2   :  { %15 = vst [vmem:[#allocation3] sm:$0x1] %v14_v0 }
   0x3   :  { %16 = vsyncpa [#allocation5], 0 }
   0x4   :  { %17 = vsyncpa [#allocation8], 0 }
   0x5   :  { %18 = vsyncpa [#allocation6], 0  ;;  %s3692_s11 = smov [#allocation4]  }
   0x6   :  { %s32_s12 = sshll.u32 %s3692_s11, 4  ;;  %s33_s12 = int_to_ptr.vmem [resolvable:$true] %s32_s12 }
   0x7   :  { %s3634_s13 = scalar_lea.vmem %s33_s12, 2048  ;;  %p3639_p1 = scmp.lt.s32.totalorder %s33_s12, %s33_s12 }
   0x8   :  { %p3635_p0 = scmp.ne.s32.totalorder %s33_s12, %s3634_s13  ;;  %p3640_p2 = scmp.lt.s32.totalorder %s3634_s13, %s3634_s13 }
   0xa   :  { %p3641_p3 = por %p3640_p2, %p3639_p1 }
   0xc   :  { %p3642_p4 = pnand %p3641_p3, %p3635_p0 }
   0xe   :  { %3645 = shalt.err (!%p3642_p4)
}
   0xf   :  { %s3693_s14 = smov 256   ;;  %s3694_s15 = smov 16  }
  0x10   :  { %38 = dma.hbm_to_vmem [thread:$0]  %s4975_s4, 2048, %s33_s12, [#allocation5], %s3693_s14, %s3693_s14, %s3694_s15  }
  0x11   :  { %s3695_s8 = smov [#allocation7]  }
  0x12   :  { %s44_s18 = sshll.u32 %s3695_s8, 4  ;;  %s45_s18 = int_to_ptr.vmem [resolvable:$true] %s44_s18 }
  0x13   :  { %s3654_s19 = scalar_lea.vmem %s45_s18, 2048  ;;  %p3659_p6 = scmp.lt.s32.totalorder %s45_s18, %s45_s18 }
  0x14   :  { %p3655_p5 = scmp.ne.s32.totalorder %s45_s18, %s3654_s19  ;;  %p3660_p7 = scmp.lt.s32.totalorder %s3654_s19, %s3654_s19 }
  0x16   :  { %p3661_p8 = por %p3660_p7, %p3659_p6 }
  0x18   :  { %p3662_p9 = pnand %p3661_p8, %p3655_p5 }
  0x1a   :  { %3665 = shalt.err (!%p3662_p9)
}
  0x1b   :  { %50 = dma.hbm_to_vmem [thread:$0]  %s4976_s5, 2048, %s45_s18, [#allocation8], %s3693_s14, %s3693_s14, %s3694_s15  }
  0x1c   :  { %3686 = dma.done.wait [#allocation5], 2048  }
  0x1d   :  { %3687 = vsyncadd [#allocation5], 4294965248 }
  0x1e   :  { %3688 = dma.done.wait [#allocation8], 2048  }
  0x1f   :  { %3689 = vsyncadd [#allocation8], 4294965248  ;;  %v4981_v1 = vmov 0.0   ;;  %v3772_v2 = vld [vmem:[%s4974_s3 + $0x78] sm:$0xff]  ;;  %v3777_v3 = vld [vmem:[%s4974_s3 + $0x70] sm:$0xff]  ;;  %vm180_vm0 = vcmask 1043456   ;;  %v121_v23 = vlaneseq }
  0x20   :  { %251 = vmatprep.mubr.f32.mxu0 %v4981_v1  ;;  %386 = vmatprep.mubr.f32.mxu1 %v4981_v1  ;;  %v3782_v4 = vld [vmem:[%s4974_s3 + $0x68] sm:$0xff]  ;;  %v3788_v5 = vld [vmem:[%s4974_s3 + $0x60] sm:$0xff]  ;;  %v3794_v6 = vld [vmem:[%s4974_s3 + $0x58] sm:$0xff]  ;;  %vm155_vm1 = vcmask 97280   ;;  %vm318_vm2 = vcmask 523264   ;;  %vm3698_vm3 = vmmov 0  }
  0x21   :  { %338 = vmatprep.subr.mxu1 %v3772_v2  ;;  %v142_v7 = vld [vmem:[%s4972_s1 + $0x18] sm:$0xf]  ;;  %v3803_v8 = vld [vmem:[%s4974_s3 + $0x50] sm:$0xff]  ;;  %v3812_v10 = vld [vmem:[%s4974_s3 + $0x48] sm:$0xff]  ;;  %v3884_v24 = vshrl.u32 %v121_v23, 7  ;;  %s3702_s5 = smov 4  }
  0x22   :  { %339 = vmatpush1.msra.mxu1 %v3777_v3  ;;  %3167 = vmatprep.subr.msk.mxu0 %vm180_vm0, %v142_v7  ;;  %v141_v9 = vld [vmem:[%s4972_s1 + $0x10] sm:$0xf]  ;;  %v140_v11 = vld [vmem:[%s4972_s1 + $0x8] sm:$0xff]  ;;  %v139_v12 = vld [vmem:[%s4972_s1] sm:$0xff]  ;;  %s3700_s1 = smov 3   ;;  %s3703_s25 = smov 6  }
  0x23   :  { %340 = vmatprep.subr.mxu1 %v3782_v4  ;;  %3168 = vmatpush1.msk.msra.mxu0 %vm180_vm0, %v141_v9  ;;  %v3824_v13 = vld [vmem:[%s4974_s3 + $0x40] sm:$0xff]  ;;  %v3833_v15 = vld [vmem:[%s4974_s3 + $0x38] sm:$0xff]  ;;  %v3839_v16 = vld [vmem:[%s4974_s3 + $0x30] sm:$0xff]  ;;  %v4983_v25 = vsub.s32 0, %v3884_v24  ;;  %v4984_v28 = vsub.s32 1, %v3884_v24  ;;  %s3704_s26 = smov 2  }
  0x24   :  { %341 = vmatpush1.msra.mxu1 %v3788_v5  ;;  %217 = vmatprep.subr.mxu0 %v140_v11  ;;  %v131_v14 = vld [vmem:[%s4971_s0] sm:$0xff]  ;;  %v3846_v17 = vld [vmem:[%s4974_s3 + $0x28] sm:$0xff]  ;;  %v3859_v19 = vld [vmem:[%s4974_s3 + $0x18] sm:$0xff]  ;;  %s3705_s27 = smov 5   ;;  %vm3125_vm4 = vcmask 7168   ;;  %vm3127_vm5 = vcmask 15360  }
  0x25   :  { %342 = vmatprep.subr.mxu1 %v3794_v6  ;;  %218 = vmatpush1.msra.mxu0 %v139_v12  ;;  %v3853_v18 = vld [vmem:[%s4974_s3 + $0x20] sm:$0xff]  ;;  %v3865_v20 = vld [vmem:[%s4974_s3 + $0x10] sm:$0xff]  ;;  %v3871_v21 = vld [vmem:[%s4974_s3 + $0x8] sm:$0xff]  ;;  %vm3129_vm6 = vcmask 23552   ;;  %vm3131_vm7 = vcmask 31744   ;;  %vm3133_vm8 = vcmask 39936  }
  0x26   :  { %343 = vmatpush1.msra.mxu1 %v3803_v8  ;;  %3169 = vmatmul.mubr.msk.f32.vlgmr.msra.gmra.mxu0 %vm155_vm1, %v131_v14  ;;  %v3877_v22 = vld [vmem:[%s4974_s3] sm:$0xff]  ;;  %v132_v45 = vld [vmem:[%s4971_s0 + $0x8] sm:$0xff]  ;;  %v133_v46 = vld [vmem:[%s4971_s0 + $0x10] sm:$0xff]  ;;  %vm3135_vm9 = vcmask 48128   ;;  %vm3137_vm10 = vcmask 56320   ;;  %vm3149_vm11 = vcmask 64512  }
  0x27   :  { %344 = vmatprep.subr.mxu1 %v3812_v10  ;;  %257 = vmatprep.mubr.f32.mxu0 %v4981_v1  ;;  %v143_v26 = vld [vmem:[%s4973_s2] sm:$0x3]  ;;  %s3697_s2 = smov 64   ;;  %v3918_v48 = vld [vmem:[#allocation4 + $0x70] sm:$0xff]  ;;  %v3924_v50 = vld [vmem:[#allocation4 + $0x68] sm:$0xff] }
  0x28   :  { %345 = vmatpush1.msra.mxu1 %v3824_v13  ;;  %v3892_v27 = vrot.slane %v143_v26, %v4983_v25  ;;  %v3898_v31 = vrot.slane %v143_v26, %v4984_v28  ;;  %v3916_v47 = vld [vmem:[#allocation4 + $0x78] sm:$0xff]  ;;  %v3926_v51 = vld [vmem:[#allocation7 + $0x70] sm:$0xff]  ;;  %v3930_v52 = vld [vmem:[#allocation4 + $0x60] sm:$0xff] }
  0x29   :  { %346 = vmatprep.subr.mxu1 %v3833_v15  ;;  %5027 = vst [vmem:[#allocation15_spill] sm:$0xff] %v3916_v47  ;;  %v3922_v49 = vld [vmem:[#allocation7 + $0x78] sm:$0xff]  ;;  %v3932_v53 = vld [vmem:[#allocation7 + $0x68] sm:$0xff]  ;;  %v3938_v55 = vld [vmem:[#allocation7 + $0x60] sm:$0xff] }
  0x2a   :  { %347 = vmatpush1.msra.mxu1 %v3839_v16  ;;  %5025 = vst [vmem:[#allocation13_spill] sm:$0xff] %v3892_v27  ;;  %5026 = vst [vmem:[#allocation14_spill] sm:$0xff] %v3898_v31  ;;  %3170 = vmatmul.mubr.msk.f32.gmra.mxu0 %vm155_vm1, %v132_v45  ;;  %v3936_v54 = vld [vmem:[#allocation4 + $0x58] sm:$0xff]  ;;  %v3942_v56 = vld [vmem:[#allocation4 + $0x50] sm:$0xff] }
  0x2b   :  { %348 = vmatprep.subr.mxu1 %v3846_v17  ;;  %263 = vmatprep.mubr.f32.mxu0 %v4981_v1  ;;  %v3944_v57 = vld [vmem:[#allocation7 + $0x58] sm:$0xff]  ;;  %v3951_v59 = vld [vmem:[#allocation4 + $0x48] sm:$0xff]  ;;  %v3955_v60 = vld [vmem:[#allocation7 + $0x50] sm:$0xff] }
  0x2c   :  { %349 = vmatpush1.msra.mxu1 %v3853_v18  ;;  %511 = vmatprep.subr.mxu0 %v3922_v49  ;;  %v134_v58 = vld [vmem:[%s4971_s0 + $0x18] sm:$0xff]  ;;  %v3959_v61 = vld [vmem:[#allocation4 + $0x40] sm:$0xff]  ;;  %v3961_v62 = vld [vmem:[#allocation7 + $0x48] sm:$0xff] }
  0x2d   :  { %350 = vmatprep.subr.mxu1 %v3859_v19  ;;  %512 = vmatpush1.msra.mxu0 %v3926_v51  ;;  %v3965_v63 = vld [vmem:[#allocation4 + $0x38] sm:$0xff]  ;;  %v3967_v0 = vld [vmem:[#allocation7 + $0x40] sm:$0xff]  ;;  %v3974_v9 = vld [vmem:[#allocation4 + $0x30] sm:$0xff] }
  0x2e   :  { %351 = vmatpush1.msra.mxu1 %v3865_v20  ;;  %3171 = vmatmul.mubr.msk.f32.gmra.mxu0 %vm155_vm1, %v133_v46  ;;  %v135_v7 = vld [vmem:[%s4971_s0 + $0x20] sm:$0xff]  ;;  %v3982_v12 = vld [vmem:[#allocation4 + $0x28] sm:$0xff]  ;;  %v3984_v14 = vld [vmem:[#allocation7 + $0x30] sm:$0xff] }
  0x2f   :  { %352 = vmatprep.subr.mxu1 %v3871_v21  ;;  %269 = vmatprep.mubr.f32.mxu0 %v4981_v1  ;;  %v3978_v11 = vld [vmem:[#allocation7 + $0x38] sm:$0xff]  ;;  %v3988_v23 = vld [vmem:[#allocation4 + $0x20] sm:$0xff]  ;;  %v3990_v26 = vld [vmem:[#allocation7 + $0x28] sm:$0xff] }
  0x30   :  { %353 = vmatpush1.msra.mxu1 %v3877_v22  ;;  %513 = vmatprep.subr.mxu0 %v3932_v53  ;;  %5028 = vst [vmem:[#allocation16_spill] sm:$0xff] %v3990_v26  ;;  %v4037_v45 = vld [vmem:[#allocation7 + $0x8] sm:$0xff]  ;;  %v4041_v46 = vld [vmem:[#allocation7] sm:$0xff] }
  0x31   :  { %387 = vmatmul.mubr.f32.vlgmr.msra.gmra.mxu1 %v4981_v1  ;;  %440 = vmatprep.subr.mxu1 %v3916_v47  ;;  %5032 = vst [vmem:[#allocation20_spill] sm:$0xff] %v4037_v45  ;;  %5033 = vst [vmem:[#allocation21_spill] sm:$0xff] %v4041_v46 }
  0x32   :  { %488 = vmatprep.mubr.f32.mxu1 %v4981_v1  ;;  %441 = vmatpush1.msra.mxu1 %v3918_v48 }
  0x33   :  { %442 = vmatprep.subr.mxu1 %v3924_v50  ;;  %514 = vmatpush1.msra.mxu0 %v3938_v55 }
  0x34   :  { %443 = vmatpush1.msra.mxu1 %v3930_v52  ;;  %515 = vmatprep.subr.mxu0 %v3944_v57 }
  0x35   :  { %444 = vmatprep.subr.mxu1 %v3936_v54  ;;  %3172 = vmatmul.mubr.msk.f32.gmra.mxu0 %vm155_vm1, %v134_v58 }
  0x36   :  { %445 = vmatpush1.msra.mxu1 %v3942_v56  ;;  %275 = vmatprep.mubr.f32.mxu0 %v4981_v1 }
  0x37   :  { %446 = vmatprep.subr.mxu1 %v3951_v59  ;;  %516 = vmatpush1.msra.mxu0 %v3955_v60 }
  0x38   :  { %447 = vmatpush1.msra.mxu1 %v3959_v61  ;;  %517 = vmatprep.subr.mxu0 %v3961_v62 }
  0x39   :  { %448 = vmatprep.subr.mxu1 %v3965_v63  ;;  %518 = vmatpush1.msra.mxu0 %v3967_v0 }
  0x3a   :  { %3173 = vmatmul.mubr.msk.f32.gmra.mxu0 %vm155_vm1, %v135_v7  ;;  %449 = vmatpush1.msra.mxu1 %v3974_v9 }
  0x3b   :  { %281 = vmatprep.mubr.f32.mxu0 %v4981_v1  ;;  %519 = vmatprep.subr.mxu0 %v3978_v11 }
  0x3c   :  { %450 = vmatprep.subr.mxu1 %v3982_v12  ;;  %520 = vmatpush1.msra.mxu0 %v3984_v14 }
  0x3d   :  { %451 = vmatpush1.msra.mxu1 %v3988_v23  ;;  %521 = vmatprep.subr.mxu0 %v3990_v26 }
  0xe6   :  { %v253_v29 = vpop.f32.mrf.mxu0 }
  0xe7   :  { %v254_v30 = vadd.f32 %v253_v29, %v3892_v27  ;;  %v136_v29 = vld [vmem:[%s4971_s0 + $0x28] sm:$0xff] }
  0xe8   :  { %v255_v32 = vpop.f32.mrf.mxu0  ;;  %3174 = vmatmul.mubr.msk.f32.gmra.mxu0 %vm155_vm1, %v136_v29 }
  0xe9   :  { %v256_v34 = vadd.f32 %v255_v32, %v3898_v31  ;;  %v4001_v32 = vld [vmem:[#allocation7 + $0x20] sm:$0xff]  ;;  %287 = vmatprep.mubr.f32.mxu0 %v4981_v1 }
  0xea   :  { %5029 = vst [vmem:[#allocation17_spill] sm:$0xff] %v4001_v32  ;;  %522 = vmatpush1.msra.mxu0 %v4001_v32 }
  0xf1   :  { %v388_v33 = vpop.f32.mrf.mxu1 }
  0xf2   :  { %v393_v35 = vadd.f32 %v388_v33, %v254_v30  ;;  %v3997_v30 = vld [vmem:[#allocation4 + $0x18] sm:$0xff]  ;;  %v4005_v33 = vld [vmem:[#allocation4 + $0x10] sm:$0xff] }
  0xf3   :  { %v390_v36 = vpop.f32.mrf.mxu1  ;;  %452 = vmatprep.subr.mxu1 %v3997_v30 }
  0xf4   :  { %v3901_v37 = vadd.f32 %v390_v36, %v256_v34  ;;  %v395_v39 = vmul.f32 0.5, %v393_v35  ;;  %v4007_v34 = vld [vmem:[#allocation7 + $0x18] sm:$0xff]  ;;  %v4011_v35 = vld [vmem:[#allocation4 + $0x8] sm:$0xff]  ;;  %v4013_v36 = vld [vmem:[#allocation7 + $0x10] sm:$0xff]  ;;  %453 = vmatpush1.msra.mxu1 %v4005_v33 }
  0xf5   :  { %5030 = vst [vmem:[#allocation18_spill] sm:$0xff] %v4007_v34  ;;  %5031 = vst [vmem:[#allocation19_spill] sm:$0xff] %v4013_v36  ;;  %523 = vmatprep.subr.mxu0 %v4007_v34  ;;  %454 = vmatprep.subr.mxu1 %v4011_v35 }
  0xf6   :  { %3450 = vtanh.f32 %v3901_v37  ;;  %524 = vmatpush1.msra.mxu0 %v4013_v36  ;;  %v396_v58 = vmul.f32 0.5, %v3901_v37  ;;  %v259_v37 = vpop.f32.mrf.mxu0 }
  0xf7   :  { %3452 = vtanh.f32 %v395_v39  ;;  %v138_v39 = vld [vmem:[%s4971_s0 + $0x38] sm:$0xff]  ;;  %525 = vmatprep.subr.mxu0 %v4037_v45 }
  0xf8   :  { %526 = vmatpush1.msra.mxu0 %v4041_v46 }
  0xf9   :  { %714 = vmatprep.subr.mxu0 %v3916_v47 }
 0x103   :  { %v3451_v38 = vpop.eup %3450 }
 0x104   :  { %406 = vrot.lane.b32.xlu0 %v3451_v38, %s3697_s2  ;;  %v3453_v40 = vpop.eup %3452  ;;  %v137_v38 = vld [vmem:[%s4971_s0 + $0x30] sm:$0xff]  ;;  %s3706_s0 = smov 7  }
 0x105   :  { %v399_v41 = vmul.f32 0.5, %v3453_v40  ;;  %3175 = vmatmul.mubr.msk.f32.gmra.mxu0 %vm155_vm1, %v137_v38 }
 0x106   :  { %293 = vmatprep.mubr.f32.mxu0 %v4981_v1 }
 0x107   :  { %v3905_v42 = vadd.f32 0.5, %v399_v41 }
 0x109   :  { %3176 = vmatmul.mubr.msk.f32.gmra.mxu0 %vm155_vm1, %v138_v39  ;;  %v404_v40 = vmul.f32 0.0, %v3905_v42 }
 0x10a   :  { %559 = vmatprep.mubr.f32.mxu0 %v4981_v1 }
 0x10d   :  { %560 = vmatmul.mubr.f32.vlgmr.msra.gmra.mxu0 %v4981_v1 }
 0x10e   :  { %715 = vmatpush1.msra.mxu0 %v3918_v48  ;;  %762 = vmatprep.mubr.f32.mxu0 %v4981_v1 }
 0x10f   :  { %716 = vmatprep.subr.mxu0 %v3924_v50 }
 0x110   :  { %717 = vmatpush1.msra.mxu0 %v3930_v52 }
 0x111   :  { %718 = vmatprep.subr.mxu0 %v3936_v54 }
 0x112   :  { %719 = vmatpush1.msra.mxu0 %v3942_v56 }
 0x113   :  { %720 = vmatprep.subr.mxu0 %v3951_v59 }
 0x114   :  { %721 = vmatpush1.msra.mxu0 %v3959_v61 }
 0x115   :  { %722 = vmatprep.subr.mxu0 %v3965_v63 }
 0x116   :  { %723 = vmatpush1.msra.mxu0 %v3974_v9 }
 0x117   :  { %724 = vmatprep.subr.mxu0 %v3982_v12 }
 0x118   :  { %725 = vmatpush1.msra.mxu0 %v3988_v23 }
 0x119   :  { %726 = vmatprep.subr.mxu0 %v3997_v30 }
 0x11a   :  { %727 = vmatpush1.msra.mxu0 %v4005_v33 }
 0x11b   :  { %728 = vmatprep.subr.mxu0 %v4011_v35 }
 0x176   :  { %v407_v43 = vpop.permute.xlu0 %406 }
 0x177   :  { %v409_v44 = vmul.f32 %v407_v43, %v3905_v42 }
 0x179   :  { %411 = vrot.lane.b32.xlu0 %v409_v44, %s3697_s2  ;;  %v4035_v44 = vld [vmem:[#allocation4] sm:$0xff] }
 0x17a   :  { %455 = vmatpush1.msra.mxu1 %v4035_v44  ;;  %729 = vmatpush1.msra.mxu0 %v4035_v44 }
 0x17b   :  { %612 = vmatprep.subr.mxu1 %v3772_v2  ;;  %889 = vmatprep.subr.mxu0 %v3772_v2 }
 0x1eb   :  { %v412_v41 = vpop.permute.xlu0 %411 }
 0x1ec   :  { %v4032_v43 = vadd.f32 %v412_v41, %v404_v40  ;;  %v261_v41 = vpop.f32.mrf.mxu0 }
 0x1ee   :  { %3454 = vtanh.f32 %v4032_v43 }
 0x1ef   :  { %3456 = vtanh.f32 %v396_v58 }
 0x1fb   :  { %v3455_v42 = vpop.eup %3454 }
 0x1fc   :  { %417 = vrot.lane.b32.xlu1 %v3455_v42, %s3697_s2  ;;  %v3457_v7 = vpop.eup %3456  ;;  %v4102_v42 = vpop.f32.mrf.mxu0 }
 0x1fd   :  { %v400_v29 = vmul.f32 0.5, %v3457_v7  ;;  %5034 = vst [vmem:[#allocation22_spill] sm:$0xff] %v4102_v42 }
 0x1fe   :  { %v4104_v58 = vpop.f32.mrf.mxu0 }
 0x1ff   :  { %v402_v38 = vadd.f32 0.5, %v400_v29  ;;  %5035 = vst [vmem:[#allocation23_spill] sm:$0xff] %v4104_v58 }
 0x200   :  { %v4106_v7 = vpop.f32.mrf.mxu0 }
 0x201   :  { %5036 = vst [vmem:[#allocation24_spill] sm:$0xff] %v4106_v7 }
 0x202   :  { %v4108_v29 = vpop.f32.mrf.mxu0 }
 0x203   :  { %5037 = vst [vmem:[#allocation25_spill] sm:$0xff] %v4108_v29  ;;  %v260_v29 = vadd.f32 %v259_v37, %v3892_v27 }
 0x26e   :  { %v418_v39 = vpop.permute.xlu1 %417 }
 0x26f   :  { %v420_v40 = vmul.f32 %v418_v39, %v402_v38  ;;  %v4110_v38 = vpop.f32.mrf.mxu0 }
 0x270   :  { %5038 = vst [vmem:[#allocation26_spill] sm:$0xff] %v4110_v38 }
 0x271   :  { %3177 = vmatmul.mubr.msk.f32.vlgmr.msra.gmra.mxu1 %vm318_vm2, %v420_v40  ;;  %v4112_v39 = vpop.f32.mrf.mxu0 }
 0x272   :  { %613 = vmatpush1.msra.mxu1 %v3777_v3  ;;  %660 = vmatprep.mubr.f32.mxu1 %v4981_v1  ;;  %5039 = vst [vmem:[#allocation27_spill] sm:$0xff] %v4112_v39  ;;  %v262_v39 = vadd.f32 %v261_v41, %v3898_v31  ;;  %v5048_v31 = vsub.s32 0, %v3884_v24 }
 0x273   :  { %614 = vmatprep.subr.mxu1 %v3782_v4 }
 0x274   :  { %615 = vmatpush1.msra.mxu1 %v3788_v5 }
 0x275   :  { %616 = vmatprep.subr.mxu1 %v3794_v6 }
 0x276   :  { %617 = vmatpush1.msra.mxu1 %v3803_v8 }
 0x277   :  { %618 = vmatprep.subr.mxu1 %v3812_v10 }
 0x278   :  { %619 = vmatpush1.msra.mxu1 %v3824_v13 }
 0x279   :  { %620 = vmatprep.subr.mxu1 %v3833_v15 }
 0x27a   :  { %621 = vmatpush1.msra.mxu1 %v3839_v16 }
 0x27b   :  { %622 = vmatprep.subr.mxu1 %v3846_v17 }
 0x27c   :  { %623 = vmatpush1.msra.mxu1 %v3853_v18 }
 0x27d   :  { %624 = vmatprep.subr.mxu1 %v3859_v19 }
 0x27e   :  { %625 = vmatpush1.msra.mxu1 %v3865_v20 }
 0x27f   :  { %626 = vmatprep.subr.mxu1 %v3871_v21 }
 0x280   :  { %627 = vmatpush1.msra.mxu1 %v3877_v22 }
 0x281   :  { %3178 = vmatmul.mubr.msk.f32.vlgmr.msra.gmra.mxu1 %vm318_vm2, %v420_v40  ;;  %788 = vmatprep.subr.mxu1 %v3922_v49  ;;  %v4114_v40 = vpop.f32.mrf.mxu0 }
 0x282   :  { %789 = vmatpush1.msra.mxu1 %v3926_v51  ;;  %836 = vmatprep.mubr.f32.mxu1 %v4981_v1  ;;  %5040 = vst [vmem:[#allocation28_spill] sm:$0xff] %v4114_v40 }
 0x283   :  { %790 = vmatprep.subr.mxu1 %v3932_v53  ;;  %v4116_v1 = vpop.f32.mrf.mxu0 }
 0x284   :  { %791 = vmatpush1.msra.mxu1 %v3938_v55  ;;  %5041 = vst [vmem:[#allocation29_spill] sm:$0xff] %v4116_v1  ;;  %v119_v1 = vld [vmem:[%s4977_s6] sm:$0x3] }
 0x285   :  { %792 = vmatprep.subr.mxu1 %v3944_v57  ;;  %v4118_v25 = vpop.f32.mrf.mxu0 }
 0x286   :  { %793 = vmatpush1.msra.mxu1 %v3955_v60  ;;  %5042 = vst [vmem:[#allocation30_spill] sm:$0xff] %v4118_v25 }
 0x287   :  { %794 = vmatprep.subr.mxu1 %v3961_v62  ;;  %v4120_v28 = vpop.f32.mrf.mxu0 }
 0x288   :  { %795 = vmatpush1.msra.mxu1 %v3967_v0  ;;  %5043 = vst [vmem:[#allocation31_spill] sm:$0xff] %v4120_v28  ;;  %v5046_v28 = vsub.s32 1, %v3884_v24 }
 0x289   :  { %796 = vmatprep.subr.mxu1 %v3978_v11 }
 0x28a   :  { %797 = vmatpush1.msra.mxu1 %v3984_v14  ;;  %v4133_v40 = vrot.slane %v119_v1, %v5046_v28 }
 0x28b   :  { %798 = vmatprep.subr.mxu1 %v3990_v26 }
 0x28c   :  { %799 = vmatpush1.msra.mxu1 %v4001_v32  ;;  %5047 = vst [vmem:[#allocation34_spill] sm:$0xff] %v4133_v40 }
 0x28d   :  { %800 = vmatprep.subr.mxu1 %v4007_v34 }
 0x28e   :  { %801 = vmatpush1.msra.mxu1 %v4013_v36 }
 0x28f   :  { %802 = vmatprep.subr.mxu1 %v4037_v45 }
 0x290   :  { %803 = vmatpush1.msra.mxu1 %v4041_v46 }
 0x291   :  { %991 = vmatprep.subr.mxu1 %v3916_v47  ;;  %v4122_v47 = vpop.f32.mrf.mxu0 }
 0x292   :  { %5044 = vst [vmem:[#allocation32_spill] sm:$0xff] %v4122_v47 }
 0x293   :  { %v4124_v42 = vpop.f32.mrf.mxu0 }
 0x294   :  { %5045 = vst [vmem:[#allocation33_spill] sm:$0xff] %v4124_v42 }
 0x295   :  { %v561_v7 = vpop.f32.mrf.mxu0 }
 0x297   :  { %v563_v38 = vpop.f32.mrf.mxu0 }
 0x331   :  { %v490_v58 = vpop.f32.mrf.mxu1 }
 0x333   :  { %v492_v46 = vpop.f32.mrf.mxu1 }
 0x334   :  { %v564_v47 = vadd.f32 %v563_v38, %v492_v46 }
 0x336   :  { %v567_v34 = vadd.f32 %v564_v47, %v4133_v40 }
 0x341   :  { %v662_v45 = vpop.f32.mrf.mxu1 }
 0x342   :  { %v667_v25 = vadd.f32 %v662_v45, %v260_v29  ;;  %v4140_v45 = vrot.slane %v119_v1, %v5048_v31  ;;  %v562_v29 = vadd.f32 %v561_v7, %v490_v58 }
 0x343   :  { %v664_v42 = vpop.f32.mrf.mxu1 }
 0x344   :  { %v668_v36 = vadd.f32 %v664_v42, %v262_v39  ;;  %v566_v28 = vadd.f32 %v562_v29, %v4140_v45  ;;  %v669_v46 = vmul.f32 0.5, %v667_v25 }
 0x346   :  { %3458 = vtanh.f32 %v668_v36  ;;  %v568_v38 = vmul.f32 0.5, %v566_v28 }
 0x347   :  { %3460 = vtanh.f32 %v567_v34 }
 0x348   :  { %3462 = vtanh.f32 %v669_v46 }
 0x349   :  { %3464 = vtanh.f32 %v568_v38  ;;  %v569_v38 = vmul.f32 0.5, %v567_v34 }
 0x353   :  { %v3459_v37 = vpop.eup %3458 }
 0x354   :  { %680 = vrot.lane.b32.xlu1 %v3459_v37, %s3697_s2  ;;  %v3461_v41 = vpop.eup %3460 }
 0x355   :  { %v3463_v47 = vpop.eup %3462 }
 0x356   :  { %v673_v42 = vmul.f32 0.5, %v3463_v47  ;;  %v3465_v39 = vpop.eup %3464 }
 0x357   :  { %v572_v27 = vmul.f32 0.5, %v3465_v39 }
 0x358   :  { %579 = vrot.lane.b32.xlu1 %v3461_v41, %s3697_s2  ;;  %v675_v40 = vadd.f32 0.5, %v673_v42 }
 0x359   :  { %v574_v41 = vadd.f32 0.5, %v572_v27 }
 0x35a   :  { %v678_v31 = vmul.f32 %v675_v40, %v4032_v43 }
 0x35b   :  { %v577_v7 = vmul.f32 0.0, %v574_v41 }
 0x3c6   :  { %v681_v37 = vpop.permute.xlu1 %680 }
 0x3c7   :  { %v683_v32 = vmul.f32 %v681_v37, %v675_v40 }
 0x3c9   :  { %685 = vrot.lane.b32.xlu0 %v683_v32, %s3697_s2  ;;  %v670_v32 = vmul.f32 0.5, %v668_v36  ;;  %v5051_v36 = vld [vmem:[#allocation17_spill] sm:$0xff] }
 0x3ca   :  { %v580_v24 = vpop.permute.xlu1 %579 }
 0x3cb   :  { %v582_v1 = vmul.f32 %v580_v24, %v574_v41 }
 0x3cd   :  { %584 = vrot.lane.b32.xlu1 %v582_v1, %s3697_s2 }
 0x43b   :  { %v686_v25 = vpop.permute.xlu0 %685 }
 0x43c   :  { %v4146_v58 = vadd.f32 %v686_v25, %v678_v31  ;;  %v5049_v31 = vmov 0.0   ;;  %v5052_v25 = vld [vmem:[#allocation18_spill] sm:$0xff] }
 0x43e   :  { %3466 = vtanh.f32 %v4146_v58 }
 0x43f   :  { %v585_v29 = vpop.permute.xlu1 %584 }
 0x440   :  { %v4149_v28 = vadd.f32 %v585_v29, %v577_v7  ;;  %v5053_v7 = vld [vmem:[#allocation19_spill] sm:$0xff]  ;;  %v5054_v29 = vld [vmem:[#allocation20_spill] sm:$0xff] }
 0x442   :  { %3468 = vtanh.f32 %v4149_v28 }
 0x443   :  { %3470 = vtanh.f32 %v670_v32 }
 0x444   :  { %3472 = vtanh.f32 %v569_v38 }
 0x44b   :  { %v3467_v46 = vpop.eup %3466 }
 0x44c   :  { %691 = vrot.lane.b32.xlu0 %v3467_v46, %s3697_s2  ;;  %v5055_v46 = vld [vmem:[#allocation21_spill] sm:$0xff] }
 0x44f   :  { %v3469_v27 = vpop.eup %3468 }
 0x450   :  { %590 = vrot.lane.b32.xlu0 %v3469_v27, %s3697_s2  ;;  %v3471_v43 = vpop.eup %3470  ;;  %v5056_v27 = vld [vmem:[#allocation15_spill] sm:$0xff] }
 0x451   :  { %v674_v40 = vmul.f32 0.5, %v3471_v43  ;;  %v3473_v47 = vpop.eup %3472 }
 0x452   :  { %v573_v39 = vmul.f32 0.5, %v3473_v47  ;;  %v5057_v47 = vld [vmem:[#allocation13_spill] sm:$0xff] }
 0x453   :  { %v676_v42 = vadd.f32 0.5, %v674_v40 }
 0x454   :  { %v575_v24 = vadd.f32 0.5, %v573_v39 }
 0x4be   :  { %v692_v37 = vpop.permute.xlu0 %691 }
 0x4bf   :  { %v694_v41 = vmul.f32 %v692_v37, %v676_v42  ;;  %v5058_v42 = vld [vmem:[#allocation22_spill] sm:$0xff] }
 0x4c0   :  { %v266_v39 = vadd.f32 %v5058_v42, %v5057_v47 }
 0x4c1   :  { %3179 = vmatmul.mubr.msk.f32.vlgmr.msra.gmra.mxu0 %vm318_vm2, %v694_v41 }
 0x4c2   :  { %890 = vmatpush1.msra.mxu0 %v3777_v3  ;;  %v591_v1 = vpop.permute.xlu0 %590  ;;  %937 = vmatprep.mubr.f32.mxu0 %v5049_v31 }
 0x4c3   :  { %891 = vmatprep.subr.mxu0 %v3782_v4  ;;  %v4158_v34 = vmul.f32 %v591_v1, %v575_v24  ;;  %v5059_v24 = vld [vmem:[#allocation14_spill] sm:$0xff]  ;;  %v5060_v1 = vld [vmem:[#allocation23_spill] sm:$0xff] }
 0x4c4   :  { %892 = vmatpush1.msra.mxu0 %v3788_v5 }
 0x4c5   :  { %5050 = vst [vmem:[#allocation35_spill] sm:$0xff] %v4158_v34  ;;  %893 = vmatprep.subr.mxu0 %v3794_v6  ;;  %3180 = vmatmul.mubr.msk.f32.vlgmr.msra.gmra.mxu1 %vm318_vm2, %v4158_v34  ;;  %v268_v34 = vadd.f32 %v5060_v1, %v5059_v24 }
 0x4c6   :  { %894 = vmatpush1.msra.mxu0 %v3803_v8  ;;  %992 = vmatpush1.msra.mxu1 %v3918_v48 }
 0x4c7   :  { %895 = vmatprep.subr.mxu0 %v3812_v10  ;;  %993 = vmatprep.subr.mxu1 %v3924_v50 }
 0x4c8   :  { %896 = vmatpush1.msra.mxu0 %v3824_v13  ;;  %994 = vmatpush1.msra.mxu1 %v3930_v52 }
 0x4c9   :  { %897 = vmatprep.subr.mxu0 %v3833_v15  ;;  %995 = vmatprep.subr.mxu1 %v3936_v54 }
 0x4ca   :  { %898 = vmatpush1.msra.mxu0 %v3839_v16  ;;  %996 = vmatpush1.msra.mxu1 %v3942_v56 }
 0x4cb   :  { %899 = vmatprep.subr.mxu0 %v3846_v17  ;;  %997 = vmatprep.subr.mxu1 %v3951_v59 }
 0x4cc   :  { %900 = vmatpush1.msra.mxu0 %v3853_v18  ;;  %998 = vmatpush1.msra.mxu1 %v3959_v61 }
 0x4cd   :  { %901 = vmatprep.subr.mxu0 %v3859_v19  ;;  %999 = vmatprep.subr.mxu1 %v3965_v63 }
 0x4ce   :  { %902 = vmatpush1.msra.mxu0 %v3865_v20  ;;  %1000 = vmatpush1.msra.mxu1 %v3974_v9 }
 0x4cf   :  { %903 = vmatprep.subr.mxu0 %v3871_v21  ;;  %1001 = vmatprep.subr.mxu1 %v3982_v12 }
 0x4d0   :  { %904 = vmatpush1.msra.mxu0 %v3877_v22  ;;  %1002 = vmatpush1.msra.mxu1 %v3988_v23 }
 0x4d1   :  { %3181 = vmatmul.mubr.msk.f32.vlgmr.msra.gmra.mxu0 %vm318_vm2, %v694_v41  ;;  %1065 = vmatprep.subr.mxu0 %v3922_v49 }
 0x4d2   :  { %1066 = vmatpush1.msra.mxu0 %v3926_v51  ;;  %1003 = vmatprep.subr.mxu1 %v3997_v30 }
 0x4d3   :  { %1067 = vmatprep.subr.mxu0 %v3932_v53  ;;  %1004 = vmatpush1.msra.mxu1 %v4005_v33 }
 0x4d4   :  { %1068 = vmatpush1.msra.mxu0 %v3938_v55  ;;  %1005 = vmatprep.subr.mxu1 %v4011_v35 }
 0x4d5   :  { %1069 = vmatprep.subr.mxu0 %v3944_v57  ;;  %1006 = vmatpush1.msra.mxu1 %v4035_v44 }
 0x4d6   :  { %1070 = vmatpush1.msra.mxu0 %v3955_v60  ;;  %1039 = vmatprep.mubr.f32.mxu1 %v5049_v31 }
 0x4d7   :  { %1071 = vmatprep.subr.mxu0 %v3961_v62  ;;  %1166 = vmatprep.subr.mxu1 %v3772_v2 }
 0x4d8   :  { %1072 = vmatpush1.msra.mxu0 %v3967_v0  ;;  %1113 = vmatprep.mubr.f32.mxu0 %v5049_v31 }
 0x4d9   :  { %1073 = vmatprep.subr.mxu0 %v3978_v11 }
 0x4da   :  { %1074 = vmatpush1.msra.mxu0 %v3984_v14 }
 0x4db   :  { %1075 = vmatprep.subr.mxu0 %v3990_v26  ;;  %v5061_v26 = vld [vmem:[#allocation34_spill] sm:$0xff] }
 0x4dc   :  { %1076 = vmatpush1.msra.mxu0 %v5051_v36 }
 0x4dd   :  { %1077 = vmatprep.subr.mxu0 %v5052_v25 }
 0x4de   :  { %1078 = vmatpush1.msra.mxu0 %v5053_v7 }
 0x4df   :  { %1079 = vmatprep.subr.mxu0 %v5054_v29 }
 0x4e0   :  { %1080 = vmatpush1.msra.mxu0 %v5055_v46 }
 0x4e1   :  { %1268 = vmatprep.subr.mxu0 %v5056_v27 }
 0x581   :  { %v764_v32 = vpop.f32.mrf.mxu0 }
 0x583   :  { %v766_v40 = vpop.f32.mrf.mxu0 }
 0x585   :  { %v838_v38 = vpop.f32.mrf.mxu1 }
 0x586   :  { %v839_v43 = vadd.f32 %v838_v38, %v764_v32 }
 0x587   :  { %v840_v37 = vpop.f32.mrf.mxu1 }
 0x588   :  { %v841_v7 = vadd.f32 %v840_v37, %v766_v40  ;;  %v843_v38 = vadd.f32 %v839_v43, %v4140_v45 }
 0x58a   :  { %v844_v46 = vadd.f32 %v841_v7, %v5061_v26  ;;  %v845_v47 = vmul.f32 0.5, %v843_v38 }
 0x591   :  { %v939_v41 = vpop.f32.mrf.mxu0 }
 0x592   :  { %v944_v25 = vadd.f32 %v939_v41, %v266_v39 }
 0x593   :  { %v941_v36 = vpop.f32.mrf.mxu0 }
 0x594   :  { %v945_v29 = vadd.f32 %v941_v36, %v268_v34  ;;  %v946_v42 = vmul.f32 0.5, %v944_v25 }
 0x596   :  { %3474 = vtanh.f32 %v945_v29 }
 0x597   :  { %3476 = vtanh.f32 %v844_v46 }
 0x598   :  { %3478 = vtanh.f32 %v946_v42 }
 0x599   :  { %3480 = vtanh.f32 %v845_v47 }
 0x5a3   :  { %v3475_v27 = vpop.eup %3474 }
 0x5a4   :  { %957 = vrot.lane.b32.xlu1 %v3475_v27, %s3697_s2  ;;  %v3477_v32 = vpop.eup %3476 }
 0x5a5   :  { %v3479_v39 = vpop.eup %3478 }
 0x5a6   :  { %v950_v40 = vmul.f32 0.5, %v3479_v39  ;;  %v3481_v37 = vpop.eup %3480 }
 0x5a7   :  { %v849_v36 = vmul.f32 0.5, %v3481_v37 }
 0x5a8   :  { %856 = vrot.lane.b32.xlu1 %v3477_v32, %s3697_s2  ;;  %v952_v34 = vadd.f32 0.5, %v950_v40 }
 0x5a9   :  { %v851_v1 = vadd.f32 0.5, %v849_v36 }
 0x5aa   :  { %v955_v43 = vmul.f32 %v952_v34, %v4146_v58  ;;  %v846_v58 = vmul.f32 0.5, %v844_v46 }
 0x5ab   :  { %v854_v47 = vmul.f32 %v851_v1, %v4149_v28 }
 0x616   :  { %v958_v7 = vpop.permute.xlu1 %957 }
 0x617   :  { %v960_v41 = vmul.f32 %v958_v7, %v952_v34 }
 0x619   :  { %962 = vrot.lane.b32.xlu0 %v960_v41, %s3697_s2 }
 0x61a   :  { %v857_v27 = vpop.permute.xlu1 %856 }
 0x61b   :  { %v859_v24 = vmul.f32 %v857_v27, %v851_v1 }
 0x61d   :  { %861 = vrot.lane.b32.xlu0 %v859_v24, %s3697_s2  ;;  %v947_v24 = vmul.f32 0.5, %v945_v29 }
 0x68b   :  { %v963_v25 = vpop.permute.xlu0 %962 }
 0x68c   :  { %v4222_v32 = vadd.f32 %v963_v25, %v955_v43 }
 0x68e   :  { %3482 = vtanh.f32 %v4222_v32 }
 0x68f   :  { %v862_v38 = vpop.permute.xlu0 %861 }
 0x690   :  { %v4226_v42 = vadd.f32 %v862_v38, %v854_v47  ;;  %v5072_v47 = vld [vmem:[#allocation14_spill] sm:$0xff]  ;;  %v5073_v38 = vld [vmem:[#allocation25_spill] sm:$0xff] }
 0x692   :  { %3484 = vtanh.f32 %v4226_v42 }
 0x693   :  { %3486 = vtanh.f32 %v947_v24 }
 0x694   :  { %3488 = vtanh.f32 %v846_v58 }
 0x69b   :  { %v3483_v39 = vpop.eup %3482 }
 0x69c   :  { %968 = vrot.lane.b32.xlu1 %v3483_v39, %s3697_s2  ;;  %v274_v39 = vadd.f32 %v5073_v38, %v5072_v47 }
 0x69f   :  { %v3485_v40 = vpop.eup %3484 }
 0x6a0   :  { %867 = vrot.lane.b32.xlu0 %v3485_v40, %s3697_s2  ;;  %v3487_v37 = vpop.eup %3486 }
 0x6a1   :  { %v951_v34 = vmul.f32 0.5, %v3487_v37  ;;  %v3489_v36 = vpop.eup %3488 }
 0x6a2   :  { %v850_v28 = vmul.f32 0.5, %v3489_v36 }
 0x6a3   :  { %v953_v7 = vadd.f32 0.5, %v951_v34 }
 0x6a4   :  { %v852_v27 = vadd.f32 0.5, %v850_v28 }
 0x70e   :  { %v969_v41 = vpop.permute.xlu1 %968 }
 0x70f   :  { %v971_v1 = vmul.f32 %v969_v41, %v953_v7 }
 0x711   :  { %3182 = vmatmul.mubr.msk.f32.vlgmr.msra.gmra.mxu1 %vm318_vm2, %v971_v1 }
 0x712   :  { %1167 = vmatpush1.msra.mxu1 %v3777_v3  ;;  %v868_v43 = vpop.permute.xlu0 %867  ;;  %1214 = vmatprep.mubr.f32.mxu1 %v5049_v31  ;;  %v5063_v3 = vld [vmem:[#allocation16_spill] sm:$0xff] }
 0x713   :  { %1168 = vmatprep.subr.mxu1 %v3782_v4  ;;  %v4235_v29 = vmul.f32 %v868_v43, %v852_v27  ;;  %v5064_v4 = vld [vmem:[#allocation17_spill] sm:$0xff] }
 0x714   :  { %1169 = vmatpush1.msra.mxu1 %v3788_v5  ;;  %v5065_v5 = vld [vmem:[#allocation18_spill] sm:$0xff] }
 0x715   :  { %5062 = vst [vmem:[#allocation22_spill] sm:$0xff] %v4235_v29  ;;  %1170 = vmatprep.subr.mxu1 %v3794_v6  ;;  %3183 = vmatmul.mubr.msk.f32.vlgmr.msra.gmra.mxu0 %vm318_vm2, %v4235_v29  ;;  %v5066_v6 = vld [vmem:[#allocation19_spill] sm:$0xff] }
 0x716   :  { %1171 = vmatpush1.msra.mxu1 %v3803_v8  ;;  %1269 = vmatpush1.msra.mxu0 %v3918_v48  ;;  %v5067_v8 = vld [vmem:[#allocation20_spill] sm:$0xff] }
 0x717   :  { %1172 = vmatprep.subr.mxu1 %v3812_v10  ;;  %1270 = vmatprep.subr.mxu0 %v3924_v50  ;;  %v5068_v10 = vld [vmem:[#allocation21_spill] sm:$0xff] }
 0x718   :  { %1173 = vmatpush1.msra.mxu1 %v3824_v13  ;;  %1271 = vmatpush1.msra.mxu0 %v3930_v52  ;;  %v5069_v13 = vld [vmem:[#allocation15_spill] sm:$0xff] }
 0x719   :  { %1174 = vmatprep.subr.mxu1 %v3833_v15  ;;  %1272 = vmatprep.subr.mxu0 %v3936_v54 }
 0x71a   :  { %1175 = vmatpush1.msra.mxu1 %v3839_v16  ;;  %1273 = vmatpush1.msra.mxu0 %v3942_v56 }
 0x71b   :  { %1176 = vmatprep.subr.mxu1 %v3846_v17  ;;  %1274 = vmatprep.subr.mxu0 %v3951_v59 }
 0x71c   :  { %1177 = vmatpush1.msra.mxu1 %v3853_v18  ;;  %1275 = vmatpush1.msra.mxu0 %v3959_v61 }
 0x71d   :  { %1178 = vmatprep.subr.mxu1 %v3859_v19  ;;  %1276 = vmatprep.subr.mxu0 %v3965_v63 }
 0x71e   :  { %1179 = vmatpush1.msra.mxu1 %v3865_v20  ;;  %1277 = vmatpush1.msra.mxu0 %v3974_v9 }
 0x71f   :  { %1180 = vmatprep.subr.mxu1 %v3871_v21  ;;  %1278 = vmatprep.subr.mxu0 %v3982_v12  ;;  %v5070_v21 = vld [vmem:[#allocation13_spill] sm:$0xff] }
 0x720   :  { %1181 = vmatpush1.msra.mxu1 %v3877_v22  ;;  %1279 = vmatpush1.msra.mxu0 %v3988_v23  ;;  %v5071_v22 = vld [vmem:[#allocation24_spill] sm:$0xff] }
 0x721   :  { %3184 = vmatmul.mubr.msk.f32.vlgmr.msra.gmra.mxu1 %vm318_vm2, %v971_v1  ;;  %1342 = vmatprep.subr.mxu1 %v3922_v49  ;;  %v272_v46 = vadd.f32 %v5071_v22, %v5070_v21 }
 0x722   :  { %1343 = vmatpush1.msra.mxu1 %v3926_v51  ;;  %1390 = vmatprep.mubr.f32.mxu1 %v5049_v31 }
 0x723   :  { %1344 = vmatprep.subr.mxu1 %v3932_v53  ;;  %1280 = vmatprep.subr.mxu0 %v3997_v30 }
 0x724   :  { %1345 = vmatpush1.msra.mxu1 %v3938_v55  ;;  %1281 = vmatpush1.msra.mxu0 %v4005_v33 }
 0x725   :  { %1346 = vmatprep.subr.mxu1 %v3944_v57  ;;  %1282 = vmatprep.subr.mxu0 %v4011_v35 }
 0x726   :  { %1347 = vmatpush1.msra.mxu1 %v3955_v60  ;;  %1283 = vmatpush1.msra.mxu0 %v4035_v44 }
 0x727   :  { %1348 = vmatprep.subr.mxu1 %v3961_v62  ;;  %1316 = vmatprep.mubr.f32.mxu0 %v5049_v31 }
 0x728   :  { %1349 = vmatpush1.msra.mxu1 %v3967_v0  ;;  %1443 = vmatprep.subr.mxu0 %v3772_v2 }
 0x729   :  { %1350 = vmatprep.subr.mxu1 %v3978_v11 }
 0x72a   :  { %1351 = vmatpush1.msra.mxu1 %v3984_v14 }
 0x72b   :  { %1352 = vmatprep.subr.mxu1 %v5063_v3 }
 0x72c   :  { %1353 = vmatpush1.msra.mxu1 %v5064_v4 }
 0x72d   :  { %1354 = vmatprep.subr.mxu1 %v5065_v5 }
 0x72e   :  { %1355 = vmatpush1.msra.mxu1 %v5066_v6 }
 0x72f   :  { %1356 = vmatprep.subr.mxu1 %v5067_v8 }
 0x730   :  { %1357 = vmatpush1.msra.mxu1 %v5068_v10 }
 0x731   :  { %1545 = vmatprep.subr.mxu1 %v5069_v13 }
 0x7d1   :  { %v1041_v15 = vpop.f32.mrf.mxu1 }
 0x7d3   :  { %v1043_v17 = vpop.f32.mrf.mxu1 }
 0x7d5   :  { %v1115_v2 = vpop.f32.mrf.mxu0 }
 0x7d6   :  { %v1116_v16 = vadd.f32 %v1115_v2, %v1041_v15 }
 0x7d7   :  { %v1117_v18 = vpop.f32.mrf.mxu0 }
 0x7d8   :  { %v1118_v19 = vadd.f32 %v1117_v18, %v1043_v17  ;;  %v1120_v36 = vadd.f32 %v1116_v16, %v4140_v45 }
 0x7da   :  { %v1121_v20 = vadd.f32 %v1118_v19, %v5061_v26  ;;  %v1122_v7 = vmul.f32 0.5, %v1120_v36 }
 0x7dc   :  { %3490 = vtanh.f32 %v1121_v20 }
 0x7e1   :  { %v1216_v25 = vpop.f32.mrf.mxu1 }
 0x7e2   :  { %v1221_v40 = vadd.f32 %v1216_v25, %v272_v46 }
 0x7e3   :  { %v1218_v24 = vpop.f32.mrf.mxu1 }
 0x7e4   :  { %v1222_v58 = vadd.f32 %v1218_v24, %v274_v39  ;;  %v1223_v28 = vmul.f32 0.5, %v1221_v40 }
 0x7e6   :  { %3492 = vtanh.f32 %v1222_v58 }
 0x7e7   :  { %3494 = vtanh.f32 %v1122_v7 }
 0x7e8   :  { %3496 = vtanh.f32 %v1223_v28 }
 0x7e9   :  { %v3491_v37 = vpop.eup %3490 }
 0x7ea   :  { %1133 = vrot.lane.b32.xlu0 %v3491_v37, %s3697_s2  ;;  %v1123_v37 = vmul.f32 0.5, %v1121_v20 }
 0x7f3   :  { %v3493_v34 = vpop.eup %3492 }
 0x7f4   :  { %1234 = vrot.lane.b32.xlu1 %v3493_v34, %s3697_s2  ;;  %v3495_v41 = vpop.eup %3494 }
 0x7f5   :  { %v1126_v1 = vmul.f32 0.5, %v3495_v41  ;;  %v3497_v15 = vpop.eup %3496 }
 0x7f6   :  { %v1227_v2 = vmul.f32 0.5, %v3497_v15 }
 0x7f7   :  { %v1128_v27 = vadd.f32 0.5, %v1126_v1 }
 0x7f8   :  { %v1229_v17 = vadd.f32 0.5, %v1227_v2 }
 0x7f9   :  { %v1131_v16 = vmul.f32 %v1128_v27, %v4226_v42  ;;  %v1224_v42 = vmul.f32 0.5, %v1222_v58 }
 0x7fa   :  { %v1232_v25 = vmul.f32 %v1229_v17, %v4222_v32 }
 0x85c   :  { %v1134_v43 = vpop.permute.xlu0 %1133 }
 0x85d   :  { %v1136_v13 = vmul.f32 %v1134_v43, %v1128_v27  ;;  %v4423_v43 = vld [vmem:[%s4974_s3] sm:$0xff] }
 0x85f   :  { %1138 = vrot.lane.b32.xlu0 %v1136_v13, %s3697_s2 }
 0x866   :  { %v1235_v18 = vpop.permute.xlu1 %1234 }
 0x867   :  { %v1237_v19 = vmul.f32 %v1235_v18, %v1229_v17 }
 0x869   :  { %1239 = vrot.lane.b32.xlu1 %v1237_v19, %s3697_s2 }
 0x8d1   :  { %v1139_v22 = vpop.permute.xlu0 %1138 }
 0x8d2   :  { %v4299_v46 = vadd.f32 %v1139_v22, %v1131_v16 }
 0x8d4   :  { %3498 = vtanh.f32 %v4299_v46 }
 0x8db   :  { %v1240_v38 = vpop.permute.xlu1 %1239 }
 0x8dc   :  { %v4303_v39 = vadd.f32 %v1240_v38, %v1232_v25 }
 0x8de   :  { %3500 = vtanh.f32 %v4303_v39 }
 0x8df   :  { %3502 = vtanh.f32 %v1123_v37 }
 0x8e0   :  { %3504 = vtanh.f32 %v1224_v42 }
 0x8e1   :  { %v3499_v40 = vpop.eup %3498 }
 0x8e2   :  { %1144 = vrot.lane.b32.xlu0 %v3499_v40, %s3697_s2 }
 0x8eb   :  { %v3501_v24 = vpop.eup %3500 }
 0x8ec   :  { %1245 = vrot.lane.b32.xlu1 %v3501_v24, %s3697_s2  ;;  %v3503_v34 = vpop.eup %3502 }
 0x8ed   :  { %v1127_v36 = vmul.f32 0.5, %v3503_v34  ;;  %v3505_v41 = vpop.eup %3504 }
 0x8ee   :  { %v1228_v1 = vmul.f32 0.5, %v3505_v41 }
 0x8ef   :  { %v1129_v7 = vadd.f32 0.5, %v1127_v36 }
 0x8f0   :  { %v1230_v20 = vadd.f32 0.5, %v1228_v1 }
 0x954   :  { %v1145_v28 = vpop.permute.xlu0 %1144 }
 0x955   :  { %v4308_v32 = vmul.f32 %v1145_v28, %v1129_v7 }
 0x957   :  { %5074 = vst [vmem:[#allocation23_spill] sm:$0xff] %v4308_v32  ;;  %3186 = vmatmul.mubr.msk.f32.vlgmr.msra.gmra.mxu1 %vm318_vm2, %v4308_v32 }
 0x958   :  { %1546 = vmatpush1.msra.mxu1 %v3918_v48  ;;  %1593 = vmatprep.mubr.f32.mxu1 %v5049_v31  ;;  %v4327_v48 = vld [vmem:[%s4974_s3 + $0x70] sm:$0xff] }
 0x959   :  { %1547 = vmatprep.subr.mxu1 %v3924_v50  ;;  %v4334_v50 = vld [vmem:[%s4974_s3 + $0x68] sm:$0xff] }
 0x95a   :  { %1548 = vmatpush1.msra.mxu1 %v3930_v52  ;;  %v4341_v52 = vld [vmem:[%s4974_s3 + $0x60] sm:$0xff] }
 0x95b   :  { %1549 = vmatprep.subr.mxu1 %v3936_v54  ;;  %v4348_v54 = vld [vmem:[%s4974_s3 + $0x58] sm:$0xff] }
 0x95c   :  { %1550 = vmatpush1.msra.mxu1 %v3942_v56  ;;  %v4355_v56 = vld [vmem:[%s4974_s3 + $0x50] sm:$0xff] }
 0x95d   :  { %1551 = vmatprep.subr.mxu1 %v3951_v59  ;;  %v4362_v59 = vld [vmem:[%s4974_s3 + $0x48] sm:$0xff] }
 0x95e   :  { %v1246_v58 = vpop.permute.xlu1 %1245  ;;  %1552 = vmatpush1.msra.mxu1 %v3959_v61  ;;  %v4369_v61 = vld [vmem:[%s4974_s3 + $0x40] sm:$0xff] }
 0x95f   :  { %v1248_v27 = vmul.f32 %v1246_v58, %v1230_v20  ;;  %1553 = vmatprep.subr.mxu1 %v3965_v63  ;;  %v4375_v63 = vld [vmem:[%s4974_s3 + $0x78] sm:$0xff] }
 0x960   :  { %1554 = vmatpush1.msra.mxu1 %v3974_v9  ;;  %v4381_v9 = vld [vmem:[%s4974_s3 + $0x38] sm:$0xff] }
 0x961   :  { %3185 = vmatmul.mubr.msk.f32.vlgmr.msra.gmra.mxu0 %vm318_vm2, %v1248_v27  ;;  %1555 = vmatprep.subr.mxu1 %v3982_v12  ;;  %v4387_v12 = vld [vmem:[%s4974_s3 + $0x30] sm:$0xff] }
 0x962   :  { %1444 = vmatpush1.msra.mxu0 %v4327_v48  ;;  %1491 = vmatprep.mubr.f32.mxu0 %v5049_v31 }
 0x963   :  { %1445 = vmatprep.subr.mxu0 %v4334_v50  ;;  %1556 = vmatpush1.msra.mxu1 %v3988_v23  ;;  %v4393_v23 = vld [vmem:[%s4974_s3 + $0x28] sm:$0xff] }
 0x964   :  { %1446 = vmatpush1.msra.mxu0 %v4341_v52  ;;  %1557 = vmatprep.subr.mxu1 %v3997_v30  ;;  %v4399_v30 = vld [vmem:[%s4974_s3 + $0x20] sm:$0xff] }
 0x965   :  { %1447 = vmatprep.subr.mxu0 %v4348_v54  ;;  %1558 = vmatpush1.msra.mxu1 %v4005_v33  ;;  %v4405_v33 = vld [vmem:[%s4974_s3 + $0x18] sm:$0xff] }
 0x966   :  { %1448 = vmatpush1.msra.mxu0 %v4355_v56  ;;  %1559 = vmatprep.subr.mxu1 %v4011_v35  ;;  %v4411_v35 = vld [vmem:[%s4974_s3 + $0x10] sm:$0xff] }
 0x967   :  { %1449 = vmatprep.subr.mxu0 %v4362_v59  ;;  %1560 = vmatpush1.msra.mxu1 %v4035_v44  ;;  %v4417_v44 = vld [vmem:[%s4974_s3 + $0x8] sm:$0xff] }
 0x968   :  { %1450 = vmatpush1.msra.mxu0 %v4369_v61  ;;  %1720 = vmatprep.subr.mxu1 %v4375_v63 }
 0x969   :  { %1451 = vmatprep.subr.mxu0 %v4381_v9 }
 0x96a   :  { %1452 = vmatpush1.msra.mxu0 %v4387_v12 }
 0x96b   :  { %1453 = vmatprep.subr.mxu0 %v4393_v23 }
 0x96c   :  { %1454 = vmatpush1.msra.mxu0 %v4399_v30 }
 0x96d   :  { %1455 = vmatprep.subr.mxu0 %v4405_v33 }
 0x96e   :  { %1456 = vmatpush1.msra.mxu0 %v4411_v35 }
 0x96f   :  { %1457 = vmatprep.subr.mxu0 %v4417_v44 }
 0x970   :  { %1458 = vmatpush1.msra.mxu0 %v4423_v43 }
 0x971   :  { %3187 = vmatmul.mubr.msk.f32.vlgmr.msra.gmra.mxu0 %vm318_vm2, %v1248_v27  ;;  %1619 = vmatprep.subr.mxu0 %v3922_v49  ;;  %v4444_v49 = vld [vmem:[#allocation4 + $0x78] sm:$0xff] }
 0x972   :  { %1620 = vmatpush1.msra.mxu0 %v3926_v51  ;;  %1667 = vmatprep.mubr.f32.mxu0 %v5049_v31  ;;  %5075 = vst [vmem:[#allocation34_spill] sm:$0xff] %v4444_v49 }
 0x973   :  { %1621 = vmatprep.subr.mxu0 %v3932_v53 }
 0x974   :  { %1622 = vmatpush1.msra.mxu0 %v3938_v55 }
 0x975   :  { %1623 = vmatprep.subr.mxu0 %v3944_v57 }
 0x976   :  { %1624 = vmatpush1.msra.mxu0 %v3955_v60 }
 0x977   :  { %1625 = vmatprep.subr.mxu0 %v3961_v62 }
 0x978   :  { %1626 = vmatpush1.msra.mxu0 %v3967_v0 }
 0x979   :  { %1627 = vmatprep.subr.mxu0 %v3978_v11  ;;  %v5076_v11 = vld [vmem:[#allocation26_spill] sm:$0xff] }
 0x97a   :  { %1628 = vmatpush1.msra.mxu0 %v3984_v14  ;;  %v278_v14 = vadd.f32 %v5076_v11, %v5070_v21  ;;  %v4475_v11 = vld [vmem:[#allocation4 + $0x68] sm:$0xff] }
 0x97b   :  { %1629 = vmatprep.subr.mxu0 %v5063_v3 }
 0x97c   :  { %1630 = vmatpush1.msra.mxu0 %v5064_v4  ;;  %v5077_v4 = vld [vmem:[#allocation27_spill] sm:$0xff] }
 0x97d   :  { %1631 = vmatprep.subr.mxu0 %v5065_v5  ;;  %v280_v5 = vadd.f32 %v5077_v4, %v5072_v47  ;;  %v4484_v4 = vld [vmem:[#allocation4 + $0x50] sm:$0xff] }
 0x97e   :  { %1632 = vmatpush1.msra.mxu0 %v5066_v6 }
 0x97f   :  { %1633 = vmatprep.subr.mxu0 %v5067_v8 }
 0x980   :  { %1634 = vmatpush1.msra.mxu0 %v5068_v10 }
 0x981   :  { %1822 = vmatprep.subr.mxu0 %v4444_v49 }
 0xa17   :  { %v1392_v51 = vpop.f32.mrf.mxu1 }
 0xa19   :  { %v1394_v57 = vpop.f32.mrf.mxu1 }
 0xa21   :  { %v1318_v53 = vpop.f32.mrf.mxu0 }
 0xa22   :  { %v1393_v55 = vadd.f32 %v1392_v51, %v1318_v53 }
 0xa23   :  { %v1320_v60 = vpop.f32.mrf.mxu0 }
 0xa24   :  { %v1395_v62 = vadd.f32 %v1394_v57, %v1320_v60  ;;  %v1397_v2 = vadd.f32 %v1393_v55, %v4140_v45 }
 0xa26   :  { %v1398_v0 = vadd.f32 %v1395_v62, %v5061_v26  ;;  %v1399_v17 = vmul.f32 0.5, %v1397_v2  ;;  %v4471_v62 = vld [vmem:[#allocation4 + $0x70] sm:$0xff]  ;;  %v4499_v2 = vld [vmem:[#allocation4 + $0x28] sm:$0xff] }
 0xa28   :  { %3506 = vtanh.f32 %v1398_v0  ;;  %v1400_v51 = vmul.f32 0.5, %v1398_v0 }
 0xa31   :  { %v1493_v3 = vpop.f32.mrf.mxu0 }
 0xa32   :  { %v1498_v6 = vadd.f32 %v1493_v3, %v278_v14  ;;  %v4478_v14 = vld [vmem:[#allocation4 + $0x60] sm:$0xff]  ;;  %v4481_v3 = vld [vmem:[#allocation4 + $0x58] sm:$0xff] }
 0xa33   :  { %v1495_v8 = vpop.f32.mrf.mxu0 }
 0xa34   :  { %v1499_v10 = vadd.f32 %v1495_v8, %v280_v5  ;;  %v1500_v18 = vmul.f32 0.5, %v1498_v6  ;;  %v4487_v6 = vld [vmem:[#allocation4 + $0x48] sm:$0xff]  ;;  %v4490_v8 = vld [vmem:[#allocation4 + $0x40] sm:$0xff] }
 0xa35   :  { %v3507_v13 = vpop.eup %3506 }
 0xa36   :  { %3508 = vtanh.f32 %v1499_v10  ;;  %1410 = vrot.lane.b32.xlu0 %v3507_v13, %s3697_s2  ;;  %v4496_v13 = vld [vmem:[#allocation4 + $0x30] sm:$0xff] }
 0xa37   :  { %3510 = vtanh.f32 %v1399_v17 }
 0xa38   :  { %3512 = vtanh.f32 %v1500_v18  ;;  %v4502_v18 = vld [vmem:[#allocation4 + $0x20] sm:$0xff] }
 0xa43   :  { %v3509_v15 = vpop.eup %3508 }
 0xa44   :  { %1511 = vrot.lane.b32.xlu1 %v3509_v15, %s3697_s2  ;;  %v3511_v19 = vpop.eup %3510 }
 0xa45   :  { %v1403_v16 = vmul.f32 0.5, %v3511_v19  ;;  %v3513_v40 = vpop.eup %3512 }
 0xa46   :  { %v1504_v24 = vmul.f32 0.5, %v3513_v40  ;;  %v4536_v40 = vld [vmem:[#allocation7 + $0x78] sm:$0xff] }
 0xa47   :  { %v1405_v22 = vadd.f32 0.5, %v1403_v16  ;;  %v4505_v16 = vld [vmem:[#allocation4 + $0x18] sm:$0xff] }
 0xa48   :  { %v1506_v37 = vadd.f32 0.5, %v1504_v24  ;;  %v4539_v24 = vld [vmem:[#allocation7 + $0x70] sm:$0xff] }
 0xa49   :  { %v1408_v36 = vmul.f32 %v1405_v22, %v4299_v46  ;;  %v1501_v46 = vmul.f32 0.5, %v1499_v10  ;;  %v4493_v10 = vld [vmem:[#allocation4 + $0x38] sm:$0xff] }
 0xa4a   :  { %v1509_v41 = vmul.f32 %v1506_v37, %v4303_v39 }
 0xaa8   :  { %v1411_v25 = vpop.permute.xlu0 %1410 }
 0xaa9   :  { %v1413_v38 = vmul.f32 %v1411_v25, %v1405_v22  ;;  %v4508_v22 = vld [vmem:[#allocation4 + $0x10] sm:$0xff]  ;;  %v4512_v25 = vld [vmem:[#allocation4 + $0x8] sm:$0xff] }
 0xaab   :  { %1415 = vrot.lane.b32.xlu0 %v1413_v38, %s3697_s2  ;;  %v4518_v38 = vld [vmem:[#allocation4] sm:$0xff] }
 0xab6   :  { %v1512_v42 = vpop.permute.xlu1 %1511 }
 0xab7   :  { %v1514_v34 = vmul.f32 %v1512_v42, %v1506_v37  ;;  %v4543_v37 = vld [vmem:[#allocation7 + $0x68] sm:$0xff]  ;;  %v4546_v42 = vld [vmem:[#allocation7 + $0x60] sm:$0xff] }
 0xab9   :  { %1516 = vrot.lane.b32.xlu1 %v1514_v34, %s3697_s2  ;;  %v4549_v34 = vld [vmem:[#allocation7 + $0x58] sm:$0xff] }
 0xb1d   :  { %v1416_v7 = vpop.permute.xlu0 %1415 }
 0xb1e   :  { %v4458_v28 = vadd.f32 %v1416_v7, %v1408_v36  ;;  %v4552_v36 = vld [vmem:[#allocation7 + $0x50] sm:$0xff]  ;;  %v4555_v7 = vld [vmem:[#allocation7 + $0x48] sm:$0xff] }
 0xb20   :  { %3514 = vtanh.f32 %v4458_v28 }
 0xb2b   :  { %v1517_v1 = vpop.permute.xlu1 %1516 }
 0xb2c   :  { %v4462_v20 = vadd.f32 %v1517_v1, %v1509_v41  ;;  %v4558_v41 = vld [vmem:[#allocation7 + $0x40] sm:$0xff]  ;;  %v4561_v1 = vld [vmem:[#allocation7 + $0x38] sm:$0xff] }
 0xb2d   :  { %v3515_v58 = vpop.eup %3514 }
 0xb2e   :  { %3516 = vtanh.f32 %v4462_v20  ;;  %1421 = vrot.lane.b32.xlu0 %v3515_v58, %s3697_s2  ;;  %v4564_v58 = vld [vmem:[#allocation7 + $0x30] sm:$0xff] }
 0xb2f   :  { %3518 = vtanh.f32 %v1400_v51  ;;  %v4570_v51 = vld [vmem:[#allocation7 + $0x20] sm:$0xff] }
 0xb30   :  { %3520 = vtanh.f32 %v1501_v46  ;;  %5080 = vst [vmem:[#allocation18_spill] sm:$0xff] %v4570_v51  ;;  %v4573_v46 = vld [vmem:[#allocation7 + $0x18] sm:$0xff] }
 0xb31   :  { %5081 = vst [vmem:[#allocation19_spill] sm:$0xff] %v4573_v46 }
 0xb3b   :  { %v3517_v27 = vpop.eup %3516 }
 0xb3c   :  { %1522 = vrot.lane.b32.xlu1 %v3517_v27, %s3697_s2  ;;  %v3519_v53 = vpop.eup %3518  ;;  %v4567_v27 = vld [vmem:[#allocation7 + $0x28] sm:$0xff] }
 0xb3d   :  { %v1404_v55 = vmul.f32 0.5, %v3519_v53  ;;  %v3521_v0 = vpop.eup %3520  ;;  %5079 = vst [vmem:[#allocation17_spill] sm:$0xff] %v4567_v27  ;;  %v4576_v53 = vld [vmem:[#allocation7 + $0x10] sm:$0xff] }
 0xb3e   :  { %v1505_v5 = vmul.f32 0.5, %v3521_v0  ;;  %5082 = vst [vmem:[#allocation20_spill] sm:$0xff] %v4576_v53 }
 0xb3f   :  { %v1406_v57 = vadd.f32 0.5, %v1404_v55  ;;  %v4579_v55 = vld [vmem:[#allocation7 + $0x8] sm:$0xff] }
 0xb40   :  { %v1507_v15 = vadd.f32 0.5, %v1505_v5  ;;  %5083 = vst [vmem:[#allocation21_spill] sm:$0xff] %v4579_v55 }
 0xba0   :  { %v1422_v60 = vpop.permute.xlu0 %1421 }
 0xba1   :  { %v4467_v39 = vmul.f32 %v1422_v60, %v1406_v57  ;;  %v4582_v57 = vld [vmem:[#allocation7] sm:$0xff] }
 0xba2   :  { %5084 = vst [vmem:[#allocation15_spill] sm:$0xff] %v4582_v57 }
 0xba3   :  { %5078 = vst [vmem:[#allocation16_spill] sm:$0xff] %v4467_v39  ;;  %3189 = vmatmul.mubr.msk.f32.vlgmr.msra.gmra.mxu0 %vm318_vm2, %v4467_v39  ;;  %v5085_v39 = vld [vmem:[#allocation28_spill] sm:$0xff] }
 0xba4   :  { %1823 = vmatpush1.msra.mxu0 %v4471_v62  ;;  %1870 = vmatprep.mubr.f32.mxu0 %v5049_v31  ;;  %v284_v29 = vadd.f32 %v5085_v39, %v5070_v21 }
 0xba5   :  { %1824 = vmatprep.subr.mxu0 %v4475_v11 }
 0xba6   :  { %1825 = vmatpush1.msra.mxu0 %v4478_v14 }
 0xba7   :  { %1826 = vmatprep.subr.mxu0 %v4481_v3 }
 0xba8   :  { %1827 = vmatpush1.msra.mxu0 %v4484_v4 }
 0xba9   :  { %1828 = vmatprep.subr.mxu0 %v4487_v6 }
 0xbaa   :  { %1829 = vmatpush1.msra.mxu0 %v4490_v8 }
 0xbab   :  { %1830 = vmatprep.subr.mxu0 %v4493_v10 }
 0xbac   :  { %1831 = vmatpush1.msra.mxu0 %v4496_v13 }
 0xbad   :  { %1832 = vmatprep.subr.mxu0 %v4499_v2 }
 0xbae   :  { %v1523_v17 = vpop.permute.xlu1 %1522  ;;  %1833 = vmatpush1.msra.mxu0 %v4502_v18 }
 0xbaf   :  { %v1525_v19 = vmul.f32 %v1523_v17, %v1507_v15  ;;  %1834 = vmatprep.subr.mxu0 %v4505_v16 }
 0xbb0   :  { %1835 = vmatpush1.msra.mxu0 %v4508_v22 }
 0xbb1   :  { %3188 = vmatmul.mubr.msk.f32.vlgmr.msra.gmra.mxu1 %vm318_vm2, %v1525_v19  ;;  %1836 = vmatprep.subr.mxu0 %v4512_v25 }
 0xbb2   :  { %1721 = vmatpush1.msra.mxu1 %v4327_v48  ;;  %1768 = vmatprep.mubr.f32.mxu1 %v5049_v31 }
 0xbb3   :  { %1722 = vmatprep.subr.mxu1 %v4334_v50  ;;  %1837 = vmatpush1.msra.mxu0 %v4518_v38 }
 0xbb4   :  { %1723 = vmatpush1.msra.mxu1 %v4341_v52  ;;  %1997 = vmatprep.subr.mxu0 %v4375_v63 }
 0xbb5   :  { %1724 = vmatprep.subr.mxu1 %v4348_v54 }
 0xbb6   :  { %1725 = vmatpush1.msra.mxu1 %v4355_v56 }
 0xbb7   :  { %1726 = vmatprep.subr.mxu1 %v4362_v59 }
 0xbb8   :  { %1727 = vmatpush1.msra.mxu1 %v4369_v61 }
 0xbb9   :  { %1728 = vmatprep.subr.mxu1 %v4381_v9 }
 0xbba   :  { %1729 = vmatpush1.msra.mxu1 %v4387_v12 }
 0xbbb   :  { %1730 = vmatprep.subr.mxu1 %v4393_v23 }
 0xbbc   :  { %1731 = vmatpush1.msra.mxu1 %v4399_v30 }
 0xbbd   :  { %1732 = vmatprep.subr.mxu1 %v4405_v33 }
 0xbbe   :  { %1733 = vmatpush1.msra.mxu1 %v4411_v35 }
 0xbbf   :  { %1734 = vmatprep.subr.mxu1 %v4417_v44 }
 0xbc0   :  { %1735 = vmatpush1.msra.mxu1 %v4423_v43 }
 0xbc1   :  { %3190 = vmatmul.mubr.msk.f32.vlgmr.msra.gmra.mxu1 %vm318_vm2, %v1525_v19  ;;  %1896 = vmatprep.subr.mxu1 %v4536_v40 }
 0xbc2   :  { %1897 = vmatpush1.msra.mxu1 %v4539_v24  ;;  %1944 = vmatprep.mubr.f32.mxu1 %v5049_v31 }
 0xbc3   :  { %1898 = vmatprep.subr.mxu1 %v4543_v37 }
 0xbc4   :  { %1899 = vmatpush1.msra.mxu1 %v4546_v42 }
 0xbc5   :  { %1900 = vmatprep.subr.mxu1 %v4549_v34 }
 0xbc6   :  { %1901 = vmatpush1.msra.mxu1 %v4552_v36 }
 0xbc7   :  { %1902 = vmatprep.subr.mxu1 %v4555_v7 }
 0xbc8   :  { %1903 = vmatpush1.msra.mxu1 %v4558_v41 }
 0xbc9   :  { %1904 = vmatprep.subr.mxu1 %v4561_v1 }
 0xbca   :  { %1905 = vmatpush1.msra.mxu1 %v4564_v58 }
 0xbcb   :  { %1906 = vmatprep.subr.mxu1 %v4567_v27 }
 0xbcc   :  { %1907 = vmatpush1.msra.mxu1 %v4570_v51 }
 0xbcd   :  { %1908 = vmatprep.subr.mxu1 %v4573_v46 }
 0xbce   :  { %1909 = vmatpush1.msra.mxu1 %v4576_v53 }
 0xbcf   :  { %1910 = vmatprep.subr.mxu1 %v4579_v55  ;;  %v5086_v55 = vld [vmem:[#allocation29_spill] sm:$0xff] }
 0xbd0   :  { %1911 = vmatpush1.msra.mxu1 %v4582_v57  ;;  %v286_v46 = vadd.f32 %v5086_v55, %v5072_v47 }
 0xbd1   :  { %2099 = vmatprep.subr.mxu1 %v4444_v49 }
 0xc63   :  { %v1669_v60 = vpop.f32.mrf.mxu0 }
 0xc65   :  { %v1671_v15 = vpop.f32.mrf.mxu0 }
 0xc71   :  { %v1595_v0 = vpop.f32.mrf.mxu1 }
 0xc72   :  { %v1670_v5 = vadd.f32 %v1669_v60, %v1595_v0 }
 0xc73   :  { %v1597_v17 = vpop.f32.mrf.mxu1 }
 0xc74   :  { %v1672_v19 = vadd.f32 %v1671_v15, %v1597_v17  ;;  %v1674_v0 = vadd.f32 %v1670_v5, %v4140_v45 }
 0xc76   :  { %v1675_v32 = vadd.f32 %v1672_v19, %v5061_v26  ;;  %v1676_v15 = vmul.f32 0.5, %v1674_v0 }
 0xc78   :  { %3522 = vtanh.f32 %v1675_v32 }
 0xc81   :  { %v1770_v53 = vpop.f32.mrf.mxu1 }
 0xc82   :  { %v1775_v51 = vadd.f32 %v1770_v53, %v284_v29 }
 0xc83   :  { %v1772_v57 = vpop.f32.mrf.mxu1 }
 0xc84   :  { %v1776_v27 = vadd.f32 %v1772_v57, %v286_v46  ;;  %v1777_v17 = vmul.f32 0.5, %v1775_v51 }
 0xc85   :  { %v3523_v49 = vpop.eup %3522 }
 0xc86   :  { %3524 = vtanh.f32 %v1776_v27  ;;  %1687 = vrot.lane.b32.xlu0 %v3523_v49, %s3697_s2 }
 0xc87   :  { %3526 = vtanh.f32 %v1676_v15 }
 0xc88   :  { %3528 = vtanh.f32 %v1777_v17 }
 0xc93   :  { %v3525_v60 = vpop.eup %3524 }
 0xc94   :  { %1788 = vrot.lane.b32.xlu1 %v3525_v60, %s3697_s2  ;;  %v3527_v39 = vpop.eup %3526 }
 0xc95   :  { %v1680_v19 = vmul.f32 0.5, %v3527_v39  ;;  %v3529_v46 = vpop.eup %3528 }
 0xc96   :  { %v1781_v53 = vmul.f32 0.5, %v3529_v46 }
 0xc97   :  { %v1682_v21 = vadd.f32 0.5, %v1680_v19 }
 0xc98   :  { %v1783_v57 = vadd.f32 0.5, %v1781_v53 }
 0xc99   :  { %v1685_v5 = vmul.f32 %v1682_v21, %v4458_v28 }
 0xc9a   :  { %v1786_v51 = vmul.f32 %v1783_v57, %v4462_v20 }
 0xcf8   :  { %v1688_v55 = vpop.permute.xlu0 %1687 }
 0xcf9   :  { %v1690_v29 = vmul.f32 %v1688_v55, %v1682_v21  ;;  %v1778_v21 = vmul.f32 0.5, %v1776_v27 }
 0xcfb   :  { %1692 = vrot.lane.b32.xlu0 %v1690_v29, %s3697_s2 }
 0xd06   :  { %v1789_v49 = vpop.permute.xlu1 %1788 }
 0xd07   :  { %v1791_v47 = vmul.f32 %v1789_v49, %v1783_v57 }
 0xd09   :  { %1793 = vrot.lane.b32.xlu1 %v1791_v47, %s3697_s2  ;;  %v1677_v47 = vmul.f32 0.5, %v1675_v32 }
 0xd6d   :  { %v1693_v60 = vpop.permute.xlu0 %1692 }
 0xd6e   :  { %v4597_v0 = vadd.f32 %v1693_v60, %v1685_v5  ;;  %v5089_v5 = vld [vmem:[#allocation18_spill] sm:$0xff]  ;;  %v5090_v60 = vld [vmem:[#allocation19_spill] sm:$0xff] }
 0xd70   :  { %3530 = vtanh.f32 %v4597_v0 }
 0xd7b   :  { %v1794_v15 = vpop.permute.xlu1 %1793 }
 0xd7c   :  { %v4601_v17 = vadd.f32 %v1794_v15, %v1786_v51  ;;  %v5091_v51 = vld [vmem:[#allocation20_spill] sm:$0xff]  ;;  %v5092_v15 = vld [vmem:[#allocation21_spill] sm:$0xff] }
 0xd7d   :  { %v3531_v39 = vpop.eup %3530 }
 0xd7e   :  { %3532 = vtanh.f32 %v4601_v17  ;;  %1698 = vrot.lane.b32.xlu0 %v3531_v39, %s3697_s2  ;;  %v5093_v39 = vld [vmem:[#allocation15_spill] sm:$0xff] }
 0xd7f   :  { %3534 = vtanh.f32 %v1677_v47 }
 0xd80   :  { %3536 = vtanh.f32 %v1778_v21 }
 0xd8b   :  { %v3533_v19 = vpop.eup %3532 }
 0xd8c   :  { %1799 = vrot.lane.b32.xlu1 %v3533_v19, %s3697_s2  ;;  %v3535_v28 = vpop.eup %3534  ;;  %v5094_v19 = vld [vmem:[#allocation34_spill] sm:$0xff] }
 0xd8d   :  { %v1681_v55 = vmul.f32 0.5, %v3535_v28  ;;  %v3537_v53 = vpop.eup %3536 }
 0xd8e   :  { %v1782_v32 = vmul.f32 0.5, %v3537_v53 }
 0xd8f   :  { %v1683_v29 = vadd.f32 0.5, %v1681_v55 }
 0xd90   :  { %v1784_v27 = vadd.f32 0.5, %v1782_v32  ;;  %v5095_v32 = vld [vmem:[#allocation13_spill] sm:$0xff] }
 0xdf0   :  { %v1699_v46 = vpop.permute.xlu0 %1698 }
 0xdf1   :  { %v4606_v20 = vmul.f32 %v1699_v46, %v1683_v29 }
 0xdf3   :  { %5087 = vst [vmem:[#allocation24_spill] sm:$0xff] %v4606_v20  ;;  %3192 = vmatmul.mubr.msk.f32.vlgmr.msra.gmra.mxu1 %vm318_vm2, %v4606_v20  ;;  %v5097_v20 = vld [vmem:[#allocation14_spill] sm:$0xff] }
 0xdf4   :  { %2100 = vmatpush1.msra.mxu1 %v4471_v62  ;;  %2147 = vmatprep.mubr.f32.mxu1 %v5049_v31 }
 0xdf5   :  { %2101 = vmatprep.subr.mxu1 %v4475_v11 }
 0xdf6   :  { %2102 = vmatpush1.msra.mxu1 %v4478_v14 }
 0xdf7   :  { %2103 = vmatprep.subr.mxu1 %v4481_v3 }
 0xdf8   :  { %2104 = vmatpush1.msra.mxu1 %v4484_v4 }
 0xdf9   :  { %2105 = vmatprep.subr.mxu1 %v4487_v6 }
 0xdfa   :  { %2106 = vmatpush1.msra.mxu1 %v4490_v8 }
 0xdfb   :  { %2107 = vmatprep.subr.mxu1 %v4493_v10 }
 0xdfc   :  { %2108 = vmatpush1.msra.mxu1 %v4496_v13 }
 0xdfd   :  { %2109 = vmatprep.subr.mxu1 %v4499_v2 }
 0xdfe   :  { %v1800_v57 = vpop.permute.xlu1 %1799  ;;  %2110 = vmatpush1.msra.mxu1 %v4502_v18 }
 0xdff   :  { %v1802_v49 = vmul.f32 %v1800_v57, %v1784_v27  ;;  %2111 = vmatprep.subr.mxu1 %v4505_v16  ;;  %v5096_v27 = vld [vmem:[#allocation30_spill] sm:$0xff] }
 0xe00   :  { %2112 = vmatpush1.msra.mxu1 %v4508_v22  ;;  %v290_v57 = vadd.f32 %v5096_v27, %v5095_v32 }
 0xe01   :  { %3191 = vmatmul.mubr.msk.f32.vlgmr.msra.gmra.mxu0 %vm318_vm2, %v1802_v49  ;;  %2113 = vmatprep.subr.mxu1 %v4512_v25 }
 0xe02   :  { %1998 = vmatpush1.msra.mxu0 %v4327_v48  ;;  %2045 = vmatprep.mubr.f32.mxu0 %v5049_v31 }
 0xe03   :  { %1999 = vmatprep.subr.mxu0 %v4334_v50  ;;  %2114 = vmatpush1.msra.mxu1 %v4518_v38 }
 0xe04   :  { %2000 = vmatpush1.msra.mxu0 %v4341_v52  ;;  %2274 = vmatprep.subr.mxu1 %v4375_v63  ;;  %v5088_v63 = vld [vmem:[#allocation17_spill] sm:$0xff] }
 0xe05   :  { %2001 = vmatprep.subr.mxu0 %v4348_v54 }
 0xe06   :  { %2002 = vmatpush1.msra.mxu0 %v4355_v56 }
 0xe07   :  { %2003 = vmatprep.subr.mxu0 %v4362_v59 }
 0xe08   :  { %2004 = vmatpush1.msra.mxu0 %v4369_v61 }
 0xe09   :  { %2005 = vmatprep.subr.mxu0 %v4381_v9 }
 0xe0a   :  { %2006 = vmatpush1.msra.mxu0 %v4387_v12 }
 0xe0b   :  { %2007 = vmatprep.subr.mxu0 %v4393_v23 }
 0xe0c   :  { %2008 = vmatpush1.msra.mxu0 %v4399_v30 }
 0xe0d   :  { %2009 = vmatprep.subr.mxu0 %v4405_v33 }
 0xe0e   :  { %2010 = vmatpush1.msra.mxu0 %v4411_v35 }
 0xe0f   :  { %2011 = vmatprep.subr.mxu0 %v4417_v44 }
 0xe10   :  { %2012 = vmatpush1.msra.mxu0 %v4423_v43 }
 0xe11   :  { %3193 = vmatmul.mubr.msk.f32.vlgmr.msra.gmra.mxu0 %vm318_vm2, %v1802_v49  ;;  %2173 = vmatprep.subr.mxu0 %v4536_v40 }
 0xe12   :  { %2174 = vmatpush1.msra.mxu0 %v4539_v24  ;;  %2221 = vmatprep.mubr.f32.mxu0 %v5049_v31 }
 0xe13   :  { %2175 = vmatprep.subr.mxu0 %v4543_v37 }
 0xe14   :  { %2176 = vmatpush1.msra.mxu0 %v4546_v42 }
 0xe15   :  { %2177 = vmatprep.subr.mxu0 %v4549_v34 }
 0xe16   :  { %2178 = vmatpush1.msra.mxu0 %v4552_v36 }
 0xe17   :  { %2179 = vmatprep.subr.mxu0 %v4555_v7 }
 0xe18   :  { %2180 = vmatpush1.msra.mxu0 %v4558_v41 }
 0xe19   :  { %2181 = vmatprep.subr.mxu0 %v4561_v1 }
 0xe1a   :  { %2182 = vmatpush1.msra.mxu0 %v4564_v58 }
 0xe1b   :  { %2183 = vmatprep.subr.mxu0 %v5088_v63 }
 0xe1c   :  { %2184 = vmatpush1.msra.mxu0 %v5089_v5 }
 0xe1d   :  { %2185 = vmatprep.subr.mxu0 %v5090_v60 }
 0xe1e   :  { %2186 = vmatpush1.msra.mxu0 %v5091_v51  ;;  %v5098_v51 = vld [vmem:[#allocation31_spill] sm:$0xff] }
 0xe1f   :  { %2187 = vmatprep.subr.mxu0 %v5092_v15  ;;  %v292_v15 = vadd.f32 %v5098_v51, %v5097_v20 }
 0xe20   :  { %2188 = vmatpush1.msra.mxu0 %v5093_v39 }
 0xe21   :  { %2376 = vmatprep.subr.mxu0 %v5094_v19 }
 0xeb3   :  { %v1946_v47 = vpop.f32.mrf.mxu1 }
 0xeb5   :  { %v1948_v55 = vpop.f32.mrf.mxu1 }
 0xec1   :  { %v1872_v21 = vpop.f32.mrf.mxu0 }
 0xec2   :  { %v1947_v28 = vadd.f32 %v1946_v47, %v1872_v21 }
 0xec3   :  { %v1874_v29 = vpop.f32.mrf.mxu0 }
 0xec4   :  { %v1949_v46 = vadd.f32 %v1948_v55, %v1874_v29  ;;  %v1951_v21 = vadd.f32 %v1947_v28, %v4140_v45 }
 0xec6   :  { %v1952_v53 = vadd.f32 %v1949_v46, %v5061_v26  ;;  %v1953_v55 = vmul.f32 0.5, %v1951_v21 }
 0xec8   :  { %3538 = vtanh.f32 %v1952_v53 }
 0xed1   :  { %v2047_v49 = vpop.f32.mrf.mxu0 }
 0xed2   :  { %v2052_v60 = vadd.f32 %v2047_v49, %v290_v57 }
 0xed3   :  { %v2049_v39 = vpop.f32.mrf.mxu0 }
 0xed4   :  { %v2053_v5 = vadd.f32 %v2049_v39, %v292_v15  ;;  %v2054_v29 = vmul.f32 0.5, %v2052_v60 }
 0xed5   :  { %v3539_v19 = vpop.eup %3538 }
 0xed6   :  { %3540 = vtanh.f32 %v2053_v5  ;;  %1964 = vrot.lane.b32.xlu0 %v3539_v19, %s3697_s2 }
 0xed7   :  { %3542 = vtanh.f32 %v1953_v55 }
 0xed8   :  { %3544 = vtanh.f32 %v2054_v29 }
 0xee3   :  { %v3541_v47 = vpop.eup %3540 }
 0xee4   :  { %2065 = vrot.lane.b32.xlu1 %v3541_v47, %s3697_s2  ;;  %v3543_v46 = vpop.eup %3542 }
 0xee5   :  { %v1957_v27 = vmul.f32 0.5, %v3543_v46  ;;  %v3545_v15 = vpop.eup %3544 }
 0xee6   :  { %v2058_v39 = vmul.f32 0.5, %v3545_v15 }
 0xee7   :  { %v1959_v32 = vadd.f32 0.5, %v1957_v27 }
 0xee8   :  { %v2060_v49 = vadd.f32 0.5, %v2058_v39 }
 0xee9   :  { %v1962_v28 = vmul.f32 %v1959_v32, %v4597_v0  ;;  %v2055_v0 = vmul.f32 0.5, %v2053_v5 }
 0xeea   :  { %v2063_v60 = vmul.f32 %v2060_v49, %v4601_v17 }
 0xf48   :  { %v1965_v51 = vpop.permute.xlu0 %1964 }
 0xf49   :  { %v1967_v57 = vmul.f32 %v1965_v51, %v1959_v32 }
 0xf4b   :  { %1969 = vrot.lane.b32.xlu0 %v1967_v57, %s3697_s2 }
 0xf56   :  { %v2066_v19 = vpop.permute.xlu1 %2065 }
 0xf57   :  { %v2068_v20 = vmul.f32 %v2066_v19, %v2060_v49 }
 0xf59   :  { %2070 = vrot.lane.b32.xlu1 %v2068_v20, %s3697_s2  ;;  %v1954_v20 = vmul.f32 0.5, %v1952_v53 }
 0xfbd   :  { %v1970_v47 = vpop.permute.xlu0 %1969 }
 0xfbe   :  { %v4674_v21 = vadd.f32 %v1970_v47, %v1962_v28 }
 0xfc0   :  { %3546 = vtanh.f32 %v4674_v21 }
 0xfcb   :  { %v2071_v55 = vpop.permute.xlu1 %2070 }
 0xfcc   :  { %v4678_v29 = vadd.f32 %v2071_v55, %v2063_v60 }
 0xfcd   :  { %v3547_v46 = vpop.eup %3546 }
 0xfce   :  { %3548 = vtanh.f32 %v4678_v29  ;;  %1975 = vrot.lane.b32.xlu0 %v3547_v46, %s3697_s2 }
 0xfcf   :  { %3550 = vtanh.f32 %v1954_v20 }
 0xfd0   :  { %3552 = vtanh.f32 %v2055_v0 }
 0xfdb   :  { %v3549_v27 = vpop.eup %3548 }
 0xfdc   :  { %2076 = vrot.lane.b32.xlu1 %v3549_v27, %s3697_s2  ;;  %v3551_v32 = vpop.eup %3550 }
 0xfdd   :  { %v1958_v51 = vmul.f32 0.5, %v3551_v32  ;;  %v3553_v39 = vpop.eup %3552 }
 0xfde   :  { %v2059_v5 = vmul.f32 0.5, %v3553_v39 }
 0xfdf   :  { %v1960_v57 = vadd.f32 0.5, %v1958_v51 }
0x1040   :  { %v1976_v15 = vpop.permute.xlu0 %1975 }
0x1041   :  { %v4683_v17 = vmul.f32 %v1976_v15, %v1960_v57  ;;  %v4769_v57 = vld [vmem:[%s4978_s7 + $0x30] sm:$0xff]  ;;  %v4778_v15 = vld [vmem:[%s4978_s7 + $0x28] sm:$0xff] }
0x1043   :  { %3195 = vmatmul.mubr.msk.f32.vlgmr.msra.gmra.mxu0 %vm318_vm2, %v4683_v17 }
0x1044   :  { %2377 = vmatpush1.msra.mxu0 %v4471_v62  ;;  %2424 = vmatprep.mubr.f32.mxu0 %v5049_v31  ;;  %v2061_v62 = vadd.f32 0.5, %v2059_v5  ;;  %v4785_v5 = vld [vmem:[%s4978_s7 + $0x20] sm:$0xff] }
0x1045   :  { %2378 = vmatprep.subr.mxu0 %v4475_v11 }
0x1046   :  { %2379 = vmatpush1.msra.mxu0 %v4478_v14 }
0x1047   :  { %2380 = vmatprep.subr.mxu0 %v4481_v3 }
0x1048   :  { %2381 = vmatpush1.msra.mxu0 %v4484_v4  ;;  %v5106_v4 = vld [vmem:[#allocation14_spill] sm:$0xff] }
0x1049   :  { %2382 = vmatprep.subr.mxu0 %v4487_v6  ;;  %v5107_v6 = vld [vmem:[#allocation33_spill] sm:$0xff] }
0x104a   :  { %2383 = vmatpush1.msra.mxu0 %v4490_v8  ;;  %v298_v8 = vadd.f32 %v5107_v6, %v5106_v4 }
0x104b   :  { %2384 = vmatprep.subr.mxu0 %v4493_v10 }
0x104c   :  { %2385 = vmatpush1.msra.mxu0 %v4496_v13 }
0x104d   :  { %2386 = vmatprep.subr.mxu0 %v4499_v2 }
0x104e   :  { %v2077_v11 = vpop.permute.xlu1 %2076  ;;  %2387 = vmatpush1.msra.mxu0 %v4502_v18 }
0x104f   :  { %v2079_v14 = vmul.f32 %v2077_v11, %v2061_v62  ;;  %2388 = vmatprep.subr.mxu0 %v4505_v16  ;;  %v4792_v62 = vld [vmem:[%s4978_s7 + $0x18] sm:$0xff] }
0x1050   :  { %2389 = vmatpush1.msra.mxu0 %v4508_v22 }
0x1051   :  { %3194 = vmatmul.mubr.msk.f32.vlgmr.msra.gmra.mxu1 %vm318_vm2, %v2079_v14  ;;  %2390 = vmatprep.subr.mxu0 %v4512_v25 }
0x1052   :  { %2275 = vmatpush1.msra.mxu1 %v4327_v48  ;;  %2322 = vmatprep.mubr.f32.mxu1 %v5049_v31  ;;  %v5099_v48 = vld [vmem:[#allocation18_spill] sm:$0xff] }
0x1053   :  { %2276 = vmatprep.subr.mxu1 %v4334_v50  ;;  %2391 = vmatpush1.msra.mxu0 %v4518_v38  ;;  %v5100_v50 = vld [vmem:[#allocation19_spill] sm:$0xff] }
0x1054   :  { %2277 = vmatpush1.msra.mxu1 %v4341_v52  ;;  %3280 = vmatprep.subr.mxu0 %v5049_v31  ;;  %v5101_v52 = vld [vmem:[#allocation20_spill] sm:$0xff] }
0x1055   :  { %2278 = vmatprep.subr.mxu1 %v4348_v54  ;;  %v5102_v54 = vld [vmem:[#allocation21_spill] sm:$0xff] }
0x1056   :  { %2279 = vmatpush1.msra.mxu1 %v4355_v56  ;;  %v5103_v56 = vld [vmem:[#allocation15_spill] sm:$0xff] }
0x1057   :  { %2280 = vmatprep.subr.mxu1 %v4362_v59 }
0x1058   :  { %2281 = vmatpush1.msra.mxu1 %v4369_v61 }
0x1059   :  { %2282 = vmatprep.subr.mxu1 %v4381_v9 }
0x105a   :  { %2283 = vmatpush1.msra.mxu1 %v4387_v12 }
0x105b   :  { %2284 = vmatprep.subr.mxu1 %v4393_v23 }
0x105c   :  { %2285 = vmatpush1.msra.mxu1 %v4399_v30 }
0x105d   :  { %2286 = vmatprep.subr.mxu1 %v4405_v33 }
0x105e   :  { %2287 = vmatpush1.msra.mxu1 %v4411_v35  ;;  %v5104_v35 = vld [vmem:[#allocation13_spill] sm:$0xff] }
0x105f   :  { %2288 = vmatprep.subr.mxu1 %v4417_v44  ;;  %v5105_v44 = vld [vmem:[#allocation32_spill] sm:$0xff] }
0x1060   :  { %2289 = vmatpush1.msra.mxu1 %v4423_v43  ;;  %v296_v43 = vadd.f32 %v5105_v44, %v5104_v35 }
0x1061   :  { %3196 = vmatmul.mubr.msk.f32.vlgmr.msra.gmra.mxu1 %vm318_vm2, %v2079_v14  ;;  %2450 = vmatprep.subr.mxu1 %v4536_v40  ;;  %v4799_v14 = vld [vmem:[%s4978_s7 + $0x10] sm:$0xff] }
0x1062   :  { %2451 = vmatpush1.msra.mxu1 %v4539_v24  ;;  %2498 = vmatprep.mubr.f32.mxu1 %v5049_v31 }
0x1063   :  { %2452 = vmatprep.subr.mxu1 %v4543_v37 }
0x1064   :  { %2453 = vmatpush1.msra.mxu1 %v4546_v42 }
0x1065   :  { %2454 = vmatprep.subr.mxu1 %v4549_v34 }
0x1066   :  { %2455 = vmatpush1.msra.mxu1 %v4552_v36 }
0x1067   :  { %2456 = vmatprep.subr.mxu1 %v4555_v7 }
0x1068   :  { %2457 = vmatpush1.msra.mxu1 %v4558_v41 }
0x1069   :  { %2458 = vmatprep.subr.mxu1 %v4561_v1 }
0x106a   :  { %2459 = vmatpush1.msra.mxu1 %v4564_v58 }
0x106b   :  { %2460 = vmatprep.subr.mxu1 %v5088_v63 }
0x106c   :  { %2461 = vmatpush1.msra.mxu1 %v5099_v48 }
0x106d   :  { %2462 = vmatprep.subr.mxu1 %v5100_v50  ;;  %v4806_v50 = vld [vmem:[%s4978_s7 + $0x8] sm:$0xff] }
0x106e   :  { %2463 = vmatpush1.msra.mxu1 %v5101_v52 }
0x106f   :  { %2464 = vmatprep.subr.mxu1 %v5102_v54 }
0x1070   :  { %2465 = vmatpush1.msra.mxu1 %v5103_v56  ;;  %v4813_v56 = vld [vmem:[%s4978_s7] sm:$0xff] }
0x1071   :  { %3299 = vmatprep.subr.mxu1 %v5049_v31 }
0x1103   :  { %v2223_v59 = vpop.f32.mrf.mxu0 }
0x1105   :  { %v2225_v12 = vpop.f32.mrf.mxu0 }
0x1111   :  { %v2149_v61 = vpop.f32.mrf.mxu1 }
0x1112   :  { %v2224_v9 = vadd.f32 %v2223_v59, %v2149_v61  ;;  %v5108_v59 = vld [vmem:[#allocation22_spill] sm:$0xff]  ;;  %v5109_v61 = vld [vmem:[#allocation35_spill] sm:$0xff] }
0x1113   :  { %v2151_v23 = vpop.f32.mrf.mxu1 }
0x1114   :  { %v2226_v30 = vadd.f32 %v2225_v12, %v2151_v23  ;;  %v2228_v22 = vadd.f32 %v2224_v9, %v4140_v45  ;;  %v5110_v9 = vld [vmem:[#allocation16_spill] sm:$0xff]  ;;  %v5111_v12 = vld [vmem:[#allocation23_spill] sm:$0xff] }
0x1116   :  { %v2229_v33 = vadd.f32 %v2226_v30, %v5061_v26  ;;  %v2230_v25 = vmul.f32 0.5, %v2228_v22 }
0x1118   :  { %3554 = vtanh.f32 %v2229_v33  ;;  %v2231_v46 = vmul.f32 0.5, %v2229_v33 }
0x1121   :  { %v2324_v3 = vpop.f32.mrf.mxu1 }
0x1122   :  { %v2329_v10 = vadd.f32 %v2324_v3, %v296_v43 }
0x1123   :  { %v2326_v13 = vpop.f32.mrf.mxu1 }
0x1124   :  { %v2330_v2 = vadd.f32 %v2326_v13, %v298_v8  ;;  %v2331_v38 = vmul.f32 0.5, %v2329_v10 }
0x1125   :  { %v3555_v18 = vpop.eup %3554 }
0x1126   :  { %3556 = vtanh.f32 %v2330_v2  ;;  %2241 = vrot.lane.b32.xlu1 %v3555_v18, %s3697_s2  ;;  %v2332_v27 = vmul.f32 0.5, %v2330_v2 }
0x1127   :  { %3558 = vtanh.f32 %v2230_v25 }
0x1128   :  { %3560 = vtanh.f32 %v2331_v38 }
0x1133   :  { %v3557_v16 = vpop.eup %3556 }
0x1134   :  { %2342 = vrot.lane.b32.xlu0 %v3557_v16, %s3697_s2  ;;  %v3559_v40 = vpop.eup %3558 }
0x1135   :  { %v2234_v24 = vmul.f32 0.5, %v3559_v40  ;;  %v3561_v36 = vpop.eup %3560 }
0x1136   :  { %v2335_v7 = vmul.f32 0.5, %v3561_v36 }
0x1137   :  { %v2236_v37 = vadd.f32 0.5, %v2234_v24 }
0x1138   :  { %v2337_v41 = vadd.f32 0.5, %v2335_v7 }
0x1139   :  { %v2239_v63 = vmul.f32 %v2236_v37, %v4674_v21 }
0x113a   :  { %v2340_v19 = vmul.f32 %v2337_v41, %v4678_v29  ;;  %v4762_v29 = vld [vmem:[%s4978_s7 + $0x38] sm:$0xff]  ;;  %s3699_s7 = smov 1  }
0x1198   :  { %v2242_v42 = vpop.permute.xlu1 %2241 }
0x1199   :  { %v2244_v34 = vmul.f32 %v2242_v42, %v2236_v37 }
0x119b   :  { %2246 = vrot.lane.b32.xlu1 %v2244_v34, %s3697_s2 }
0x11a6   :  { %v2343_v1 = vpop.permute.xlu0 %2342 }
0x11a7   :  { %v2345_v58 = vmul.f32 %v2343_v1, %v2337_v41 }
0x11a9   :  { %2347 = vrot.lane.b32.xlu0 %v2345_v58, %s3697_s2  ;;  %v3701_v58 = vmov 0  }
0x11aa   :  { %3448 = vset.pattern.permute.xlu1 %v3701_v58  ;;  %3449 = vset.pattern.permute.xlu0 %v3701_v58 }
0x120d   :  { %v2247_v53 = vpop.permute.xlu1 %2246 }
0x120e   :  { %v4751_v49 = vadd.f32 %v2247_v53, %v2239_v63 }
0x1210   :  { %3562 = vtanh.f32 %v4751_v49 }
0x121b   :  { %v2348_v28 = vpop.permute.xlu0 %2347 }
0x121c   :  { %v2350_v47 = vadd.f32 %v2348_v28, %v2340_v19  ;;  %v3207_v28 = vld [vmem:[#allocation3] ss:$0 sm:$0xff] }
0x121d   :  { %v3563_v60 = vpop.eup %3562 }
0x121e   :  { %3564 = vtanh.f32 %v2350_v47  ;;  %2252 = vrot.lane.b32.xlu1 %v3563_v60, %s3697_s2 }
0x121f   :  { %3566 = vtanh.f32 %v2231_v46 }
0x1220   :  { %3568 = vtanh.f32 %v2332_v27 }
0x122b   :  { %v3565_v55 = vpop.eup %3564 }
0x122c   :  { %2353 = vrot.lane.b32.xlu0 %v3565_v55, %s3697_s2  ;;  %v3567_v21 = vpop.eup %3566 }
0x122d   :  { %v2235_v20 = vmul.f32 0.5, %v3567_v21  ;;  %v3569_v39 = vpop.eup %3568 }
0x122e   :  { %v2336_v11 = vmul.f32 0.5, %v3569_v39 }
0x122f   :  { %v2237_v0 = vadd.f32 0.5, %v2235_v20 }
0x1230   :  { %v2338_v48 = vadd.f32 0.5, %v2336_v11 }
0x1290   :  { %v2253_v32 = vpop.permute.xlu1 %2252 }
0x1291   :  { %v4757_v51 = vmul.f32 %v2253_v32, %v2237_v0 }
0x1293   :  { %3198 = vmatmul.mubr.msk.f32.vlgmr.msra.gmra.mxu1 %vm318_vm2, %v4757_v51 }
0x1294   :  { %3300 = vmatpush3.msra.mxu1 %v4762_v29  ;;  %3315 = vmatprep.mubr.msk.f32.mxu1 %vm3698_vm3, %v5049_v31 }
0x1295   :  { %3301 = vmatprep.subr.mxu1 %v5049_v31 }
0x1296   :  { %3302 = vmatpush3.msra.mxu1 %v4769_v57 }
0x1297   :  { %3303 = vmatprep.subr.mxu1 %v5049_v31 }
0x1298   :  { %3304 = vmatpush3.msra.mxu1 %v4778_v15 }
0x1299   :  { %3305 = vmatprep.subr.mxu1 %v5049_v31 }
0x129a   :  { %3306 = vmatpush3.msra.mxu1 %v4785_v5 }
0x129b   :  { %3307 = vmatprep.subr.mxu1 %v5049_v31 }
0x129c   :  { %3308 = vmatpush3.msra.mxu1 %v4792_v62 }
0x129d   :  { %3309 = vmatprep.subr.mxu1 %v5049_v31 }
0x129e   :  { %3310 = vmatpush3.msra.mxu1 %v4799_v14  ;;  %v2354_v52 = vpop.permute.xlu0 %2353 }
0x129f   :  { %v2356_v54 = vmul.f32 %v2354_v52, %v2338_v48  ;;  %3311 = vmatprep.subr.mxu1 %v5049_v31 }
0x12a0   :  { %3312 = vmatpush3.msra.mxu1 %v4806_v50 }
0x12a1   :  { %3197 = vmatmul.mubr.msk.f32.vlgmr.msra.gmra.mxu0 %vm318_vm2, %v2356_v54  ;;  %3313 = vmatprep.subr.mxu1 %v5049_v31 }
0x12a2   :  { %3281 = vmatpush3.msra.mxu0 %v4762_v29  ;;  %3314 = vmatpush3.msra.mxu1 %v4813_v56 }
0x12a3   :  { %3282 = vmatprep.subr.mxu0 %v5049_v31  ;;  %3316 = vmatmul.mubr.msk.f32.vlgmr.msra.gmra.mxu1 %vm318_vm2, %v5108_v59 }
0x12a4   :  { %3283 = vmatpush3.msra.mxu0 %v4769_v57  ;;  %3337 = vmatprep.subr.mxu1 %v5049_v31 }
0x12a5   :  { %3284 = vmatprep.subr.mxu0 %v5049_v31  ;;  %3338 = vmatpush3.msra.mxu1 %v4762_v29 }
0x12a6   :  { %3285 = vmatpush3.msra.mxu0 %v4778_v15  ;;  %3339 = vmatprep.subr.mxu1 %v5049_v31 }
0x12a7   :  { %3286 = vmatprep.subr.mxu0 %v5049_v31  ;;  %3340 = vmatpush3.msra.mxu1 %v4769_v57 }
0x12a8   :  { %3287 = vmatpush3.msra.mxu0 %v4785_v5  ;;  %3341 = vmatprep.subr.mxu1 %v5049_v31 }
0x12a9   :  { %3288 = vmatprep.subr.mxu0 %v5049_v31  ;;  %3342 = vmatpush3.msra.mxu1 %v4778_v15 }
0x12aa   :  { %3289 = vmatpush3.msra.mxu0 %v4792_v62  ;;  %3343 = vmatprep.subr.mxu1 %v5049_v31 }
0x12ab   :  { %3290 = vmatprep.subr.mxu0 %v5049_v31  ;;  %3344 = vmatpush3.msra.mxu1 %v4785_v5 }
0x12ac   :  { %3291 = vmatpush3.msra.mxu0 %v4799_v14  ;;  %3345 = vmatprep.subr.mxu1 %v5049_v31 }
0x12ad   :  { %3292 = vmatprep.subr.mxu0 %v5049_v31  ;;  %3346 = vmatpush3.msra.mxu1 %v4792_v62 }
0x12ae   :  { %3293 = vmatpush3.msra.mxu0 %v4806_v50  ;;  %3347 = vmatprep.subr.mxu1 %v5049_v31 }
0x12af   :  { %3294 = vmatprep.subr.mxu0 %v5049_v31  ;;  %3348 = vmatpush3.msra.mxu1 %v4799_v14 }
0x12b0   :  { %3295 = vmatpush3.msra.mxu0 %v4813_v56  ;;  %3296 = vmatprep.mubr.msk.f32.mxu0 %vm3698_vm3, %v5049_v31 }
0x12b1   :  { %3349 = vmatprep.subr.mxu1 %v5049_v31  ;;  %3297 = vmatmul.mubr.msk.f32.vlgmr.msra.gmra.mxu0 %vm318_vm2, %v5109_v61 }
0x12b2   :  { %3318 = vmatprep.subr.mxu0 %v5049_v31  ;;  %3350 = vmatpush3.msra.mxu1 %v4806_v50 }
0x12b3   :  { %3319 = vmatpush3.msra.mxu0 %v4762_v29  ;;  %3351 = vmatprep.subr.mxu1 %v5049_v31 }
0x12b4   :  { %3320 = vmatprep.subr.mxu0 %v5049_v31  ;;  %3352 = vmatpush3.msra.mxu1 %v4813_v56 }
0x12b5   :  { %3353 = vmatprep.mubr.msk.f32.mxu1 %vm3698_vm3, %v5049_v31  ;;  %3321 = vmatpush3.msra.mxu0 %v4769_v57 }
0x12b6   :  { %3354 = vmatmul.mubr.msk.f32.vlgmr.msra.gmra.mxu1 %vm318_vm2, %v5110_v9  ;;  %3375 = vmatprep.subr.mxu1 %v5049_v31 }
0x12b7   :  { %3322 = vmatprep.subr.mxu0 %v5049_v31  ;;  %3376 = vmatpush3.msra.mxu1 %v4762_v29 }
0x12b8   :  { %3323 = vmatpush3.msra.mxu0 %v4778_v15  ;;  %3377 = vmatprep.subr.mxu1 %v5049_v31 }
0x12b9   :  { %3324 = vmatprep.subr.mxu0 %v5049_v31  ;;  %3378 = vmatpush3.msra.mxu1 %v4769_v57 }
0x12ba   :  { %3325 = vmatpush3.msra.mxu0 %v4785_v5  ;;  %3379 = vmatprep.subr.mxu1 %v5049_v31 }
0x12bb   :  { %3326 = vmatprep.subr.mxu0 %v5049_v31  ;;  %3380 = vmatpush3.msra.mxu1 %v4778_v15 }
0x12bc   :  { %3327 = vmatpush3.msra.mxu0 %v4792_v62  ;;  %3381 = vmatprep.subr.mxu1 %v5049_v31 }
0x12bd   :  { %3328 = vmatprep.subr.mxu0 %v5049_v31  ;;  %3382 = vmatpush3.msra.mxu1 %v4785_v5 }
0x12be   :  { %3329 = vmatpush3.msra.mxu0 %v4799_v14  ;;  %3383 = vmatprep.subr.mxu1 %v5049_v31 }
0x12bf   :  { %3330 = vmatprep.subr.mxu0 %v5049_v31  ;;  %3384 = vmatpush3.msra.mxu1 %v4792_v62 }
0x12c0   :  { %3331 = vmatpush3.msra.mxu0 %v4806_v50  ;;  %3385 = vmatprep.subr.mxu1 %v5049_v31 }
0x12c1   :  { %3332 = vmatprep.subr.mxu0 %v5049_v31  ;;  %3386 = vmatpush3.msra.mxu1 %v4799_v14 }
0x12c2   :  { %3333 = vmatpush3.msra.mxu0 %v4813_v56  ;;  %3334 = vmatprep.mubr.msk.f32.mxu0 %vm3698_vm3, %v5049_v31 }
0x12c3   :  { %3387 = vmatprep.subr.mxu1 %v5049_v31  ;;  %3335 = vmatmul.mubr.msk.f32.vlgmr.msra.gmra.mxu0 %vm318_vm2, %v5111_v12 }
0x12c4   :  { %3356 = vmatprep.subr.mxu0 %v5049_v31  ;;  %3388 = vmatpush3.msra.mxu1 %v4806_v50 }
0x12c5   :  { %3357 = vmatpush3.msra.mxu0 %v4762_v29  ;;  %3389 = vmatprep.subr.mxu1 %v5049_v31 }
0x12c6   :  { %3358 = vmatprep.subr.mxu0 %v5049_v31  ;;  %3390 = vmatpush3.msra.mxu1 %v4813_v56 }
0x12c7   :  { %3391 = vmatprep.mubr.msk.f32.mxu1 %vm3698_vm3, %v5049_v31  ;;  %3359 = vmatpush3.msra.mxu0 %v4769_v57 }
0x12c8   :  { %3392 = vmatmul.mubr.msk.f32.vlgmr.msra.gmra.mxu1 %vm318_vm2, %v4683_v17  ;;  %3360 = vmatprep.subr.mxu0 %v5049_v31  ;;  %v5112_v17 = vld [vmem:[#allocation24_spill] sm:$0xff] }
0x12c9   :  { %3361 = vmatpush3.msra.mxu0 %v4778_v15  ;;  %3372 = vmatprep.mubr.msk.f32.mxu0 %vm3698_vm3, %v5049_v31 }
0x12ca   :  { %3362 = vmatprep.subr.mxu0 %v5049_v31  ;;  %3413 = vmatprep.subr.mxu1 %v5049_v31 }
0x12cb   :  { %3363 = vmatpush3.msra.mxu0 %v4785_v5  ;;  %3414 = vmatpush3.msra.mxu1 %v4762_v29 }
0x12cc   :  { %3364 = vmatprep.subr.mxu0 %v5049_v31  ;;  %3415 = vmatprep.subr.mxu1 %v5049_v31 }
0x12cd   :  { %3365 = vmatpush3.msra.mxu0 %v4792_v62  ;;  %3416 = vmatpush3.msra.mxu1 %v4769_v57 }
0x12ce   :  { %3366 = vmatprep.subr.mxu0 %v5049_v31  ;;  %3417 = vmatprep.subr.mxu1 %v5049_v31 }
0x12cf   :  { %3367 = vmatpush3.msra.mxu0 %v4799_v14  ;;  %3418 = vmatpush3.msra.mxu1 %v4778_v15 }
0x12d0   :  { %3368 = vmatprep.subr.mxu0 %v5049_v31  ;;  %3419 = vmatprep.subr.mxu1 %v5049_v31 }
0x12d1   :  { %3369 = vmatpush3.msra.mxu0 %v4806_v50  ;;  %3420 = vmatpush3.msra.mxu1 %v4785_v5 }
0x12d2   :  { %3370 = vmatprep.subr.mxu0 %v5049_v31  ;;  %3421 = vmatprep.subr.mxu1 %v5049_v31 }
0x12d3   :  { %3371 = vmatpush3.msra.mxu0 %v4813_v56  ;;  %3422 = vmatpush3.msra.mxu1 %v4792_v62 }
0x12d4   :  { %3373 = vmatmul.mubr.msk.f32.vlgmr.msra.gmra.mxu0 %vm318_vm2, %v5112_v17  ;;  %3394 = vmatprep.subr.mxu0 %v5049_v31 }
0x12d5   :  { %3395 = vmatpush3.msra.mxu0 %v4762_v29  ;;  %3410 = vmatprep.mubr.msk.f32.mxu0 %vm3698_vm3, %v5049_v31 }
0x12d6   :  { %3396 = vmatprep.subr.mxu0 %v5049_v31  ;;  %3423 = vmatprep.subr.mxu1 %v5049_v31 }
0x12d7   :  { %3397 = vmatpush3.msra.mxu0 %v4769_v57  ;;  %3424 = vmatpush3.msra.mxu1 %v4799_v14 }
0x12d8   :  { %3398 = vmatprep.subr.mxu0 %v5049_v31  ;;  %3425 = vmatprep.subr.mxu1 %v5049_v31 }
0x12d9   :  { %3399 = vmatpush3.msra.mxu0 %v4778_v15  ;;  %3426 = vmatpush3.msra.mxu1 %v4806_v50 }
0x12da   :  { %3400 = vmatprep.subr.mxu0 %v5049_v31  ;;  %3427 = vmatprep.subr.mxu1 %v5049_v31 }
0x12db   :  { %3401 = vmatpush3.msra.mxu0 %v4785_v5  ;;  %3428 = vmatpush3.msra.mxu1 %v4813_v56 }
0x12dc   :  { %3402 = vmatprep.subr.mxu0 %v5049_v31  ;;  %3429 = vmatprep.mubr.msk.f32.mxu1 %vm3698_vm3, %v5049_v31 }
0x12dd   :  { %3403 = vmatpush3.msra.mxu0 %v4792_v62 }
0x12de   :  { %3404 = vmatprep.subr.mxu0 %v5049_v31 }
0x12df   :  { %3405 = vmatpush3.msra.mxu0 %v4799_v14 }
0x12e0   :  { %3406 = vmatprep.subr.mxu0 %v5049_v31 }
0x12e1   :  { %3407 = vmatpush3.msra.mxu0 %v4806_v50 }
0x12e2   :  { %3408 = vmatprep.subr.mxu0 %v5049_v31 }
0x12e3   :  { %3409 = vmatpush3.msra.mxu0 %v4813_v56 }
0x12e4   :  { %3411 = vmatmul.mubr.msk.f32.vlgmr.msra.gmra.mxu0 %vm318_vm2, %v4757_v51 }
0x1353   :  { %v2500_v23 = vpop.f32.mrf.mxu1 }
0x1355   :  { %v2502_v30 = vpop.f32.mrf.mxu1 }
0x1361   :  { %v2426_v33 = vpop.f32.mrf.mxu0 }
0x1362   :  { %v2501_v35 = vadd.f32 %v2500_v23, %v2426_v33 }
0x1363   :  { %v2428_v44 = vpop.f32.mrf.mxu0  ;;  %v2669_v43 = vpop.f32.mrf.mxu1 }
0x1364   :  { %v2503_v3 = vadd.f32 %v2502_v30, %v2428_v44  ;;  %v2505_v42 = vadd.f32 %v2501_v35, %v4140_v45 }
0x1365   :  { %v3317_v4 = vpop.f32.mrf.mxu1 }
0x1366   :  { %v2506_v6 = vadd.f32 %v2503_v3, %v5061_v26  ;;  %v2507_v26 = vmul.f32 0.5, %v2505_v42 }
0x1368   :  { %3570 = vtanh.f32 %v2506_v6  ;;  %v2508_v47 = vmul.f32 0.5, %v2506_v6 }
0x1369   :  { %3572 = vtanh.f32 %v2507_v26 }
0x1371   :  { %v4959_v8 = vpop.f32.mrf.mxu0 }
0x1373   :  { %v3298_v10 = vpop.f32.mrf.mxu0 }
0x1375   :  { %v3571_v31 = vpop.eup %3570 }
0x1376   :  { %v2809_v13 = vpop.f32.mrf.mxu1  ;;  %2518 = vrot.lane.b32.xlu1 %v3571_v31, %s3697_s2  ;;  %v3573_v34 = vpop.eup %3572 }
0x1377   :  { %v2511_v36 = vmul.f32 0.5, %v3573_v34 }
0x1378   :  { %v3355_v2 = vpop.f32.mrf.mxu1 }
0x1379   :  { %v2513_v7 = vadd.f32 0.5, %v2511_v36 }
0x137b   :  { %v2516_v45 = vmul.f32 %v2513_v7, %v4751_v49 }
0x1383   :  { %v2739_v18 = vpop.f32.mrf.mxu0 }
0x1385   :  { %v3336_v16 = vpop.f32.mrf.mxu0 }
0x1388   :  { %v2949_v22 = vpop.f32.mrf.mxu1 }
0x138a   :  { %v3393_v25 = vpop.f32.mrf.mxu1 }
0x1394   :  { %v2879_v38 = vpop.f32.mrf.mxu0 }
0x1396   :  { %v3374_v40 = vpop.f32.mrf.mxu0 }
0x13a4   :  { %v3019_v24 = vpop.f32.mrf.mxu0 }
0x13a6   :  { %v3412_v37 = vpop.f32.mrf.mxu0 }
0x13e8   :  { %v2519_v41 = vpop.permute.xlu1 %2518 }
0x13e9   :  { %v2521_v1 = vmul.f32 %v2519_v41, %v2513_v7 }
0x13eb   :  { %2523 = vrot.lane.b32.xlu0 %v2521_v1, %s3697_s2 }
0x13ef   :  { %3098 = vrot.lane.b32.xlu0 %v2669_v43, %s3699_s7 }
0x13f3   :  { %3106 = vrot.lane.b32.xlu0 %v2809_v13, %s3700_s1 }
0x13f7   :  { %3110 = vrot.lane.b32.xlu0 %v2879_v38, %s3702_s5 }
0x13fb   :  { %3118 = vrot.lane.b32.xlu0 %v3019_v24, %s3703_s25 }
0x145d   :  { %v2524_v63 = vpop.permute.xlu0 %2523 }
0x145e   :  { %v2526_v53 = vadd.f32 %v2524_v63, %v2516_v45 }
0x1460   :  { %3574 = vtanh.f32 %v2526_v53 }
0x1461   :  { %3576 = vtanh.f32 %v2508_v47  ;;  %v3099_v0 = vpop.permute.xlu0 %3098 }
0x1462   :  { %v3126_v57 = vsel %vm3125_vm4, %v4959_v8, %v3099_v0 }
0x1465   :  { %v3107_v51 = vpop.permute.xlu0 %3106 }
0x1469   :  { %v3111_v39 = vpop.permute.xlu0 %3110 }
0x146d   :  { %v3575_v19 = vpop.eup %3574  ;;  %v3119_v48 = vpop.permute.xlu0 %3118 }
0x146e   :  { %2529 = vrot.lane.b32.xlu1 %v3575_v19, %s3697_s2  ;;  %v3577_v60 = vpop.eup %3576  ;;  %s3707_s2 = smov [#allocation9]  }
0x146f   :  { %v2512_v55 = vmul.f32 0.5, %v3577_v60  ;;  %s3157_s28 = sshll.u32 %s3707_s2, 4  ;;  %s3158_s28 = int_to_ptr.vmem [resolvable:$true] %s3157_s28 }
0x1470   :  { %s3666_s6 = scalar_lea.vmem %s3158_s28, 128  ;;  %p3671_p11 = scmp.lt.s32.totalorder %s3158_s28, %s3158_s28 }
0x1471   :  { %v2514_v46 = vadd.f32 0.5, %v2512_v55  ;;  %p3667_p10 = scmp.ne.s32.totalorder %s3158_s28, %s3666_s6  ;;  %p3672_p12 = scmp.lt.s32.totalorder %s3666_s6, %s3666_s6 }
0x1472   :  { %3102 = vrot.lane.b32.xlu1 %v2739_v18, %s3704_s26 }
0x1473   :  { %p3673_p13 = por %p3672_p12, %p3671_p11 }
0x1475   :  { %p3674_p0 = pnand %p3673_p13, %p3667_p10 }
0x1476   :  { %3145 = vperm.xlu1 %3448, %v3207_v28  }
0x147a   :  { %3114 = vrot.lane.b32.xlu1 %v2949_v22, %s3705_s27 }
0x14e0   :  { %v2530_v27 = vpop.permute.xlu1 %2529 }
0x14e1   :  { %v2532_v21 = vmul.f32 %v2530_v27, %v2514_v46 }
0x14e3   :  { %3430 = vmatmul.mubr.msk.f32.vlgmr.msra.gmra.mxu1 %vm318_vm2, %v2532_v21 }
0x14e4   :  { %v3103_v32 = vpop.permute.xlu1 %3102 }
0x14e5   :  { %v3128_v15 = vsel %vm3127_vm5, %v3126_v57, %v3103_v32 }
0x14e6   :  { %v3130_v5 = vsel %vm3129_vm6, %v3128_v15, %v3107_v51 }
0x14e7   :  { %v3132_v11 = vsel %vm3131_vm7, %v3130_v5, %v3111_v39 }
0x14f1   :  { %v3146_v29 = vpop.permute.xlu1 %3145 }
0x14f5   :  { %v3115_v62 = vpop.permute.xlu1 %3114 }
0x14f6   :  { %v3134_v14 = vsel %vm3133_vm8, %v3132_v11, %v3115_v62 }
0x14f7   :  { %v3136_v50 = vsel %vm3135_vm9, %v3134_v14, %v3119_v48 }
0x15a3   :  { %v3092_v49 = vpop.f32.mrf.mxu1 }
0x15a4   :  { %3122 = vrot.lane.b32.xlu1 %v3092_v49, %s3706_s0 }
0x15a5   :  { %v3431_v20 = vpop.f32.mrf.mxu1 }
0x1616   :  { %v3123_v52 = vpop.permute.xlu1 %3122 }
0x1617   :  { %v3138_v54 = vsel %vm3137_vm10, %v3136_v50, %v3123_v52 }
0x1618   :  { %v3148_v56 = vadd.f32 %v3146_v29, %v3138_v54 }
0x161a   :  { %3150 = vst.msk [vmem:[#allocation9] sm:$0xff] %vm3149_vm11, %v3148_v56 }
0x161b   :  { %3677 = shalt.err (!%p3674_p0)
}
0x161c   :  { %3160 = dma.vmem_to_hbm [thread:$0]  %s3158_s28, 128, %s4980_s9, [#allocation6]  }
0x161d   :  { %3690 = dma.done.wait [#allocation6], 128  }
0x161e   :  { %3691 = vsyncadd [#allocation6], 4294967168 }
0x161f   :  { %3164 = vsyncpa [#allocation5], 1 }
0x1620   :  { %3165 = vsyncpa [#allocation8], 1 }
0x1621   :  { %3166 = vsyncpa [#allocation6], 1 }

</bundles_post_ra>
